<compile_context>
chip_gen: v7x
topology: tpu7x:2x2x1
jax: 0.10.0
libtpu: 0.0.40
codegen_flags: <defaults>
</compile_context>

<pallas_src>
import jax
import jax.numpy as jnp
import numpy as np
from jax import lax
from jax.experimental import pallas as pl
from jax.experimental.pallas import tpu as pltpu

# Switch to jnp.bfloat16 for production (halves HBM/VMEM traffic, native MXU bf16 rate on
# v5e/v6e/v7x; keep f32 accumulation + f32 gate math). Kept f32 here so the f32 reference
# assertion below stays tight.
MATMUL_DTYPE = jnp.float32


def _round_up(x, m):
    return ((x + m - 1) // m) * m


# ----------------------------- Conv stack kernel (conv2..conv4) -----------------------------

def _conv5_cols(x, w, b, cols):
    """Valid (5,1) conv along the leading height axis.

    x: (h_in, cols, c_in) f32, w: (5, c_in, c_out), b: (1, c_out) -> (h_out, cols, c_out).
    Each tap is a single (h_out*cols, c_in)@(c_in, c_out) MXU matmul (cols % 8 == 0, so the
    3D<->2D reshapes are layout-trivial and the tap slice is on the untiled outer axis).
    """
    h_in, _, c_in = x.shape
    c_out = w.shape[2]
    h_out = h_in - 4
    acc = jnp.zeros((h_out * cols, c_out), jnp.float32)
    for kh in range(5):
        tap = x[kh:kh + h_out].reshape(h_out * cols, c_in)
        acc = acc + jnp.dot(tap.astype(MATMUL_DTYPE), w[kh].astype(MATMUL_DTYPE),
                            preferred_element_type=jnp.float32)
    return (acc + b).reshape(h_out, cols, c_out)


def conv_stack_kernel(x_ref, w2, b2, w3, b3, w4, b4, o_ref):
    cols = x_ref.shape[1]
    h = x_ref[...]
    h = _conv5_cols(h, w2[...], b2[...], cols)
    h = _conv5_cols(h, w3[...], b3[...], cols)
    h = _conv5_cols(h, w4[...], b4[...], cols)
    o_ref[...] = h


def conv_stack234(h1, conv_params, cols_blk):
    """h1: (H1, NC_pad, 64) conv1 output (height, b*W + w columns, channels) -> (H1-12, NC_pad, 64)."""
    H1, NCp, _ = h1.shape
    Ho = H1 - 12
    (w2, b2), (w3, b3), (w4, b4) = conv_params
    b2r, b3r, b4r = (b.reshape(1, 64) for b in (b2, b3, b4))
    wspec = pl.BlockSpec((5, 64, 64), lambda j: (0, 0, 0))
    bspec = pl.BlockSpec((1, 64), lambda j: (0, 0))
    return pl.pallas_call(
        conv_stack_kernel,
        out_shape=jax.ShapeDtypeStruct((Ho, NCp, 64), jnp.float32),
        grid_spec=pltpu.PrefetchScalarGridSpec(
            num_scalar_prefetch=0,
            grid=(NCp // cols_blk,),
            in_specs=[
                pl.BlockSpec((H1, cols_blk, 64), lambda j: (0, j, 0)),
                wspec, bspec, wspec, bspec, wspec, bspec,
            ],
            out_specs=pl.BlockSpec((Ho, cols_blk, 64), lambda j: (0, j, 0)),
        ),
        compiler_params=pltpu.CompilerParams(dimension_semantics=("parallel",)),
    )(h1, w2, b2r, w3, b3r, w4, b4r)


# ------------------------------- GRU recurrence kernel ----------------------------
# Input projection (x@W + b) is hoisted out of this kernel; only the recurrent h@U matmul
# and the gate math run inside the sequential time loop.

def gru_rec_kernel(wv_ref, u_ref, o_ref, h_scratch):
    @pl.when(pl.program_id(0) == 0)
    def _():
        h_scratch[...] = jnp.zeros_like(h_scratch)

    Hh = h_scratch.shape[1]
    kt = wv_ref.shape[0]
    u = u_ref[...].astype(MATMUL_DTYPE)

    def step(k, h):
        wv = wv_ref[k]                                     # (B, 3H), bias already folded in
        uv = jnp.dot(h.astype(MATMUL_DTYPE), u, preferred_element_type=jnp.float32)
        r = jax.nn.sigmoid(wv[:, :Hh] + uv[:, :Hh])
        z = jax.nn.sigmoid(wv[:, Hh:2 * Hh] + uv[:, Hh:2 * Hh])
        c = jnp.tanh(wv[:, 2 * Hh:] + r * uv[:, 2 * Hh:])
        h_new = z * h + (1.0 - z) * c
        o_ref[k] = h_new
        return h_new

    h_scratch[...] = lax.fori_loop(0, kt, step, h_scratch[...], unroll=True)


def _pick_kt(T, max_kt=8):
    """Largest divisor of T that is <= max_kt (timesteps per grid step)."""
    for k in range(min(T, max_kt), 0, -1):
        if T % k == 0:
            return k
    return 1


def gru_recurrence(wv, Ug):
    """wv: (T, B, 3H) precomputed x@W + b (time-major); Ug: (H, 3H). Returns (T, B, H)."""
    T, B, G = wv.shape
    Hh = Ug.shape[0]
    kt = _pick_kt(T)
    return pl.pallas_call(
        gru_rec_kernel,
        out_shape=jax.ShapeDtypeStruct((T, B, Hh), jnp.float32),
        grid_spec=pltpu.PrefetchScalarGridSpec(
            num_scalar_prefetch=0,
            grid=(T // kt,),
            in_specs=[
                pl.BlockSpec((kt, B, G), lambda t: (t, 0, 0)),
                pl.BlockSpec((Hh, G), lambda t: (0, 0)),
            ],
            out_specs=pl.BlockSpec((kt, B, Hh), lambda t: (t, 0, 0)),
            scratch_shapes=[pltpu.VMEM((B, Hh), jnp.float32)],
        ),
        compiler_params=pltpu.CompilerParams(dimension_semantics=("arbitrary",)),
    )(wv, Ug)


# --------------------------------- Full forward -------------------------------

@jax.jit
def deep_conv_gru_forward(x, params):
    """x: (B, H, W) f32 (module input before unsqueeze(1)).

    Returns (seq_out (B, T, 128) batch_first, h (num_layers, B, 128)) with T = H - 16.
    """
    B, H, Wd = x.shape
    T = H - 16
    Ho1 = H - 4
    (w1, b1) = params["conv"][0]

    # conv1 (Cin=1): XLA broadcast-multiply with W on the lane axis; produce the
    # (height, b*W + w, channel) layout the Pallas conv kernel consumes (channels on lanes).
    taps = jnp.stack([x[:, kh:kh + Ho1, :] for kh in range(5)], axis=-1)   # (B, Ho1, W, 5)
    h1 = jnp.einsum('btwk,kc->tbwc', taps, w1[:, 0, :]) + b1               # (Ho1, B, W, 64)
    h1 = h1.reshape(Ho1, B * Wd, 64)

    NC = B * Wd
    cols_blk = min(256, _round_up(NC, 8))
    nc_pad = _round_up(NC, cols_blk)
    if nc_pad != NC:
        h1 = jnp.pad(h1, ((0, 0), (0, nc_pad - NC), (0, 0)))

    conv_out = conv_stack234(h1, params["conv"][1:], cols_blk)             # (T, nc_pad, 64)
    conv_t = conv_out[:, :NC, :].reshape(T, B, Wd, 64)                     # (t, b, w, c)

    hiddens = []
    z = conv_t
    for li, (Wg, Ug, bg) in enumerate(params["gru"]):
        Hh = Ug.shape[0]
        if li == 0:
            # Hoisted input projection. PyTorch feature order is c*W + w; instead of
            # transposing the activations, reorder Wg's rows to (w, c) and contract directly
            # against the conv output layout.
            Wg_r = Wg.reshape(64, Wd, 3 * Hh).transpose(1, 0, 2)           # (W, 64, 3H)
            wv = jnp.einsum('tbwc,wcg->tbg', z, Wg_r) + bg                 # (T, B, 3H)
        else:
            wv = jnp.einsum('tbd,dg->tbg', z, Wg) + bg                     # (T, B, 3H)
        z = gru_recurrence(wv, Ug)                                         # (T, B, Hh)
        hiddens.append(z[-1])

    seq_out = jnp.transpose(z, (1, 0, 2))                                  # batch_first (B, T, Hh)
    return seq_out, jnp.stack(hiddens)


# ------------------------------ Pure-JAX reference ----------------------------

def ref_forward(x, params):
    B, H, Wd = x.shape
    xc = x[:, None, :, :]  # (B, 1, H, W) NCHW
    for (wk, bk) in params["conv"]:
        cout = wk.shape[2]
        hin = xc.shape[2]
        ho = hin - 4
        acc = jnp.zeros((B, cout, ho, Wd), jnp.float32)
        for kh in range(5):
            acc = acc + jnp.einsum('bihw,io->bohw', xc[:, :, kh:kh + ho, :], wk[kh])
        xc = acc + bk.reshape(1, cout, 1, 1)
    seq = jnp.transpose(xc, (0, 2, 1, 3)).reshape(B, H - 16, -1)  # (B, T, D), feature = c*W + w

    hiddens = []
    for (Wg, Ug, bg) in params["gru"]:
        Hh = Ug.shape[0]

        def step(h, x_t, Wg=Wg, Ug=Ug, bg=bg, Hh=Hh):
            wv = x_t @ Wg
            uv = h @ Ug
            r = jax.nn.sigmoid(wv[:, :Hh] + uv[:, :Hh] + bg[:, :Hh])
            zt = jax.nn.sigmoid(wv[:, Hh:2 * Hh] + uv[:, Hh:2 * Hh] + bg[:, Hh:2 * Hh])
            c = jnp.tanh(wv[:, 2 * Hh:] + r * uv[:, 2 * Hh:] + bg[:, 2 * Hh:])
            h_new = zt * h + (1.0 - zt) * c
            return h_new, h_new

        h0 = jnp.zeros((B, Hh), jnp.float32)
        _, ys = jax.lax.scan(step, h0, jnp.transpose(seq, (1, 0, 2)))
        seq = jnp.transpose(ys, (1, 0, 2))
        hiddens.append(seq[:, -1])
    return seq, jnp.stack(hiddens)


# ----------------------------------- Params -----------------------------------

def init_params(key, w_feat, hidden=128, num_layers=2):
    params = {"conv": [], "gru": []}
    cins = [1, 64, 64, 64]
    for cin in cins:
        key, k1, k2 = jax.random.split(key, 3)
        wk = 0.1 * jax.random.normal(k1, (5, cin, 64), jnp.float32)   # (kh, Cin, Cout)
        bk = 0.1 * jax.random.normal(k2, (64,), jnp.float32)
        params["conv"].append((wk, bk))
    d_in = 64 * w_feat
    for _ in range(num_layers):
        key, k1, k2 = jax.random.split(key, 3)
        Wg = 0.1 * jax.random.normal(k1, (d_in, 3 * hidden), jnp.float32)
        Ug = 0.1 * jax.random.normal(k2, (hidden, 3 * hidden), jnp.float32)
        bg = jnp.ones((1, 3 * hidden), jnp.float32)                   # repo inits biases to 1
        params["gru"].append((Wg, Ug, bg))
        d_in = hidden
    return params


if __name__ == "__main__":
    # Small shapes consistent with the module: input (B, H, W); 4x (5,1) convs need H > 16.
    # W=2 -> GRU input size 64*2 = 128 (module uses W=113 -> 7232); hidden = 128 as in module.
    B, H, Wd = 2, 24, 2
    key = jax.random.PRNGKey(0)
    key, kx = jax.random.split(key)
    x = jax.random.normal(kx, (B, H, Wd), jnp.float32)
    params = init_params(key, Wd, hidden=128, num_layers=2)

    seq_out, h = deep_conv_gru_forward(x, params)
    jax.block_until_ready((seq_out, h))

    ref_seq, ref_h = ref_forward(x, params)
    np.testing.assert_allclose(np.asarray(seq_out), np.asarray(ref_seq), atol=1e-2, rtol=1e-2)
    np.testing.assert_allclose(np.asarray(h), np.asarray(ref_h), atol=1e-2, rtol=1e-2)

    assert seq_out.shape == (B, H - 16, 128) and h.shape == (2, B, 128)
    print("KERNEL_OK")
</pallas_src>

<mosaic_0001>
module attributes {stable_mosaic.version = 11 : i64} {
  func.func @conv_stack_kernel(%arg0: i32, %arg1: memref<20x8x64xf32, #tpu.memory_space<vmem>>, %arg2: memref<5x64x64xf32, #tpu.memory_space<vmem>>, %arg3: memref<1x64xf32, #tpu.memory_space<vmem>>, %arg4: memref<5x64x64xf32, #tpu.memory_space<vmem>>, %arg5: memref<1x64xf32, #tpu.memory_space<vmem>>, %arg6: memref<5x64x64xf32, #tpu.memory_space<vmem>>, %arg7: memref<1x64xf32, #tpu.memory_space<vmem>>, %arg8: memref<8x8x64xf32, #tpu.memory_space<vmem>>) attributes {dimension_semantics = [#tpu.dimension_semantics<parallel>], iteration_bounds = array<i64: 1>, scalar_prefetch = 0 : i64, scratch_operands = 0 : i64, tpu.core_type = #tpu.core_type<tc>, window_params = [{transform_indices = @transform_0, window_bounds = array<i64: 20, 8, 64>}, {pipeline_mode = #tpu.pipeline_mode<synchronous>, transform_indices = @transform_1, window_bounds = array<i64: 5, 64, 64>}, {pipeline_mode = #tpu.pipeline_mode<synchronous>, transform_indices = @transform_2, window_bounds = array<i64: 1, 64>}, {pipeline_mode = #tpu.pipeline_mode<synchronous>, transform_indices = @transform_3, window_bounds = array<i64: 5, 64, 64>}, {pipeline_mode = #tpu.pipeline_mode<synchronous>, transform_indices = @transform_4, window_bounds = array<i64: 1, 64>}, {pipeline_mode = #tpu.pipeline_mode<synchronous>, transform_indices = @transform_5, window_bounds = array<i64: 5, 64, 64>}, {pipeline_mode = #tpu.pipeline_mode<synchronous>, transform_indices = @transform_6, window_bounds = array<i64: 1, 64>}, {transform_indices = @transform_7, window_bounds = array<i64: 8, 8, 64>}]} {
    %c0 = arith.constant 0 : index
    %c0_0 = arith.constant 0 : index
    %c0_1 = arith.constant 0 : index
    %0 = vector.load %arg1[%c0, %c0_0, %c0_1] : memref<20x8x64xf32, #tpu.memory_space<vmem>>, vector<20x8x64xf32>
    %c0_2 = arith.constant 0 : index
    %c0_3 = arith.constant 0 : index
    %c0_4 = arith.constant 0 : index
    %1 = vector.load %arg2[%c0_2, %c0_3, %c0_4] : memref<5x64x64xf32, #tpu.memory_space<vmem>>, vector<5x64x64xf32>
    %c0_5 = arith.constant 0 : index
    %c0_6 = arith.constant 0 : index
    %2 = vector.load %arg3[%c0_5, %c0_6] : memref<1x64xf32, #tpu.memory_space<vmem>>, vector<1x64xf32>
    %cst = arith.constant 0.000000e+00 : f32
    %3 = vector.broadcast %cst : f32 to vector<128x64xf32>
    %4 = vector.extract_strided_slice %0 {offsets = [0, 0, 0], sizes = [16, 8, 64], strides = [1, 1, 1]} : vector<20x8x64xf32> to vector<16x8x64xf32>
    %5 = vector.shape_cast %4 : vector<16x8x64xf32> to vector<128x64xf32>
    %6 = vector.extract_strided_slice %1 {offsets = [0, 0, 0], sizes = [1, 64, 64], strides = [1, 1, 1]} : vector<5x64x64xf32> to vector<1x64x64xf32>
    %7 = vector.shape_cast %6 : vector<1x64x64xf32> to vector<64x64xf32>
    %cst_7 = arith.constant dense<0.000000e+00> : vector<128x64xf32>
    %8 = tpu.matmul %5, %7, %cst_7 {dimension_numbers = #tpu.dot_dimension_numbers<[1], [0], [0], [1], [0, 0, 1, 1], [], []>} : vector<128x64xf32>, vector<64x64xf32>, vector<128x64xf32> -> vector<128x64xf32>
    %9 = arith.addf %3, %8 : vector<128x64xf32>
    %10 = vector.extract_strided_slice %0 {offsets = [1, 0, 0], sizes = [16, 8, 64], strides = [1, 1, 1]} : vector<20x8x64xf32> to vector<16x8x64xf32>
    %11 = vector.shape_cast %10 : vector<16x8x64xf32> to vector<128x64xf32>
    %12 = vector.extract_strided_slice %1 {offsets = [1, 0, 0], sizes = [1, 64, 64], strides = [1, 1, 1]} : vector<5x64x64xf32> to vector<1x64x64xf32>
    %13 = vector.shape_cast %12 : vector<1x64x64xf32> to vector<64x64xf32>
    %cst_8 = arith.constant dense<0.000000e+00> : vector<128x64xf32>
    %14 = tpu.matmul %11, %13, %cst_8 {dimension_numbers = #tpu.dot_dimension_numbers<[1], [0], [0], [1], [0, 0, 1, 1], [], []>} : vector<128x64xf32>, vector<64x64xf32>, vector<128x64xf32> -> vector<128x64xf32>
    %15 = arith.addf %9, %14 : vector<128x64xf32>
    %16 = vector.extract_strided_slice %0 {offsets = [2, 0, 0], sizes = [16, 8, 64], strides = [1, 1, 1]} : vector<20x8x64xf32> to vector<16x8x64xf32>
    %17 = vector.shape_cast %16 : vector<16x8x64xf32> to vector<128x64xf32>
    %18 = vector.extract_strided_slice %1 {offsets = [2, 0, 0], sizes = [1, 64, 64], strides = [1, 1, 1]} : vector<5x64x64xf32> to vector<1x64x64xf32>
    %19 = vector.shape_cast %18 : vector<1x64x64xf32> to vector<64x64xf32>
    %cst_9 = arith.constant dense<0.000000e+00> : vector<128x64xf32>
    %20 = tpu.matmul %17, %19, %cst_9 {dimension_numbers = #tpu.dot_dimension_numbers<[1], [0], [0], [1], [0, 0, 1, 1], [], []>} : vector<128x64xf32>, vector<64x64xf32>, vector<128x64xf32> -> vector<128x64xf32>
    %21 = arith.addf %15, %20 : vector<128x64xf32>
    %22 = vector.extract_strided_slice %0 {offsets = [3, 0, 0], sizes = [16, 8, 64], strides = [1, 1, 1]} : vector<20x8x64xf32> to vector<16x8x64xf32>
    %23 = vector.shape_cast %22 : vector<16x8x64xf32> to vector<128x64xf32>
    %24 = vector.extract_strided_slice %1 {offsets = [3, 0, 0], sizes = [1, 64, 64], strides = [1, 1, 1]} : vector<5x64x64xf32> to vector<1x64x64xf32>
    %25 = vector.shape_cast %24 : vector<1x64x64xf32> to vector<64x64xf32>
    %cst_10 = arith.constant dense<0.000000e+00> : vector<128x64xf32>
    %26 = tpu.matmul %23, %25, %cst_10 {dimension_numbers = #tpu.dot_dimension_numbers<[1], [0], [0], [1], [0, 0, 1, 1], [], []>} : vector<128x64xf32>, vector<64x64xf32>, vector<128x64xf32> -> vector<128x64xf32>
    %27 = arith.addf %21, %26 : vector<128x64xf32>
    %28 = vector.extract_strided_slice %0 {offsets = [4, 0, 0], sizes = [16, 8, 64], strides = [1, 1, 1]} : vector<20x8x64xf32> to vector<16x8x64xf32>
    %29 = vector.shape_cast %28 : vector<16x8x64xf32> to vector<128x64xf32>
    %30 = vector.extract_strided_slice %1 {offsets = [4, 0, 0], sizes = [1, 64, 64], strides = [1, 1, 1]} : vector<5x64x64xf32> to vector<1x64x64xf32>
    %31 = vector.shape_cast %30 : vector<1x64x64xf32> to vector<64x64xf32>
    %cst_11 = arith.constant dense<0.000000e+00> : vector<128x64xf32>
    %32 = tpu.matmul %29, %31, %cst_11 {dimension_numbers = #tpu.dot_dimension_numbers<[1], [0], [0], [1], [0, 0, 1, 1], [], []>} : vector<128x64xf32>, vector<64x64xf32>, vector<128x64xf32> -> vector<128x64xf32>
    %33 = arith.addf %27, %32 : vector<128x64xf32>
    %34 = vector.broadcast %2 : vector<1x64xf32> to vector<128x64xf32>
    %35 = arith.addf %33, %34 : vector<128x64xf32>
    %36 = vector.shape_cast %35 : vector<128x64xf32> to vector<16x8x64xf32>
    %c0_12 = arith.constant 0 : index
    %c0_13 = arith.constant 0 : index
    %c0_14 = arith.constant 0 : index
    %37 = vector.load %arg4[%c0_12, %c0_13, %c0_14] : memref<5x64x64xf32, #tpu.memory_space<vmem>>, vector<5x64x64xf32>
    %c0_15 = arith.constant 0 : index
    %c0_16 = arith.constant 0 : index
    %38 = vector.load %arg5[%c0_15, %c0_16] : memref<1x64xf32, #tpu.memory_space<vmem>>, vector<1x64xf32>
    %cst_17 = arith.constant 0.000000e+00 : f32
    %39 = vector.broadcast %cst_17 : f32 to vector<96x64xf32>
    %40 = vector.extract_strided_slice %36 {offsets = [0, 0, 0], sizes = [12, 8, 64], strides = [1, 1, 1]} : vector<16x8x64xf32> to vector<12x8x64xf32>
    %41 = vector.shape_cast %40 : vector<12x8x64xf32> to vector<96x64xf32>
    %42 = vector.extract_strided_slice %37 {offsets = [0, 0, 0], sizes = [1, 64, 64], strides = [1, 1, 1]} : vector<5x64x64xf32> to vector<1x64x64xf32>
    %43 = vector.shape_cast %42 : vector<1x64x64xf32> to vector<64x64xf32>
    %cst_18 = arith.constant dense<0.000000e+00> : vector<96x64xf32>
    %44 = tpu.matmul %41, %43, %cst_18 {dimension_numbers = #tpu.dot_dimension_numbers<[1], [0], [0], [1], [0, 0, 1, 1], [], []>} : vector<96x64xf32>, vector<64x64xf32>, vector<96x64xf32> -> vector<96x64xf32>
    %45 = arith.addf %39, %44 : vector<96x64xf32>
    %46 = vector.extract_strided_slice %36 {offsets = [1, 0, 0], sizes = [12, 8, 64], strides = [1, 1, 1]} : vector<16x8x64xf32> to vector<12x8x64xf32>
    %47 = vector.shape_cast %46 : vector<12x8x64xf32> to vector<96x64xf32>
    %48 = vector.extract_strided_slice %37 {offsets = [1, 0, 0], sizes = [1, 64, 64], strides = [1, 1, 1]} : vector<5x64x64xf32> to vector<1x64x64xf32>
    %49 = vector.shape_cast %48 : vector<1x64x64xf32> to vector<64x64xf32>
    %cst_19 = arith.constant dense<0.000000e+00> : vector<96x64xf32>
    %50 = tpu.matmul %47, %49, %cst_19 {dimension_numbers = #tpu.dot_dimension_numbers<[1], [0], [0], [1], [0, 0, 1, 1], [], []>} : vector<96x64xf32>, vector<64x64xf32>, vector<96x64xf32> -> vector<96x64xf32>
    %51 = arith.addf %45, %50 : vector<96x64xf32>
    %52 = vector.extract_strided_slice %36 {offsets = [2, 0, 0], sizes = [12, 8, 64], strides = [1, 1, 1]} : vector<16x8x64xf32> to vector<12x8x64xf32>
    %53 = vector.shape_cast %52 : vector<12x8x64xf32> to vector<96x64xf32>
    %54 = vector.extract_strided_slice %37 {offsets = [2, 0, 0], sizes = [1, 64, 64], strides = [1, 1, 1]} : vector<5x64x64xf32> to vector<1x64x64xf32>
    %55 = vector.shape_cast %54 : vector<1x64x64xf32> to vector<64x64xf32>
    %cst_20 = arith.constant dense<0.000000e+00> : vector<96x64xf32>
    %56 = tpu.matmul %53, %55, %cst_20 {dimension_numbers = #tpu.dot_dimension_numbers<[1], [0], [0], [1], [0, 0, 1, 1], [], []>} : vector<96x64xf32>, vector<64x64xf32>, vector<96x64xf32> -> vector<96x64xf32>
    %57 = arith.addf %51, %56 : vector<96x64xf32>
    %58 = vector.extract_strided_slice %36 {offsets = [3, 0, 0], sizes = [12, 8, 64], strides = [1, 1, 1]} : vector<16x8x64xf32> to vector<12x8x64xf32>
    %59 = vector.shape_cast %58 : vector<12x8x64xf32> to vector<96x64xf32>
    %60 = vector.extract_strided_slice %37 {offsets = [3, 0, 0], sizes = [1, 64, 64], strides = [1, 1, 1]} : vector<5x64x64xf32> to vector<1x64x64xf32>
    %61 = vector.shape_cast %60 : vector<1x64x64xf32> to vector<64x64xf32>
    %cst_21 = arith.constant dense<0.000000e+00> : vector<96x64xf32>
    %62 = tpu.matmul %59, %61, %cst_21 {dimension_numbers = #tpu.dot_dimension_numbers<[1], [0], [0], [1], [0, 0, 1, 1], [], []>} : vector<96x64xf32>, vector<64x64xf32>, vector<96x64xf32> -> vector<96x64xf32>
    %63 = arith.addf %57, %62 : vector<96x64xf32>
    %64 = vector.extract_strided_slice %36 {offsets = [4, 0, 0], sizes = [12, 8, 64], strides = [1, 1, 1]} : vector<16x8x64xf32> to vector<12x8x64xf32>
    %65 = vector.shape_cast %64 : vector<12x8x64xf32> to vector<96x64xf32>
    %66 = vector.extract_strided_slice %37 {offsets = [4, 0, 0], sizes = [1, 64, 64], strides = [1, 1, 1]} : vector<5x64x64xf32> to vector<1x64x64xf32>
    %67 = vector.shape_cast %66 : vector<1x64x64xf32> to vector<64x64xf32>
    %cst_22 = arith.constant dense<0.000000e+00> : vector<96x64xf32>
    %68 = tpu.matmul %65, %67, %cst_22 {dimension_numbers = #tpu.dot_dimension_numbers<[1], [0], [0], [1], [0, 0, 1, 1], [], []>} : vector<96x64xf32>, vector<64x64xf32>, vector<96x64xf32> -> vector<96x64xf32>
    %69 = arith.addf %63, %68 : vector<96x64xf32>
    %70 = vector.broadcast %38 : vector<1x64xf32> to vector<96x64xf32>
    %71 = arith.addf %69, %70 : vector<96x64xf32>
    %72 = vector.shape_cast %71 : vector<96x64xf32> to vector<12x8x64xf32>
    %c0_23 = arith.constant 0 : index
    %c0_24 = arith.constant 0 : index
    %c0_25 = arith.constant 0 : index
    %73 = vector.load %arg6[%c0_23, %c0_24, %c0_25] : memref<5x64x64xf32, #tpu.memory_space<vmem>>, vector<5x64x64xf32>
    %c0_26 = arith.constant 0 : index
    %c0_27 = arith.constant 0 : index
    %74 = vector.load %arg7[%c0_26, %c0_27] : memref<1x64xf32, #tpu.memory_space<vmem>>, vector<1x64xf32>
    %cst_28 = arith.constant 0.000000e+00 : f32
    %75 = vector.broadcast %cst_28 : f32 to vector<64x64xf32>
    %76 = vector.extract_strided_slice %72 {offsets = [0, 0, 0], sizes = [8, 8, 64], strides = [1, 1, 1]} : vector<12x8x64xf32> to vector<8x8x64xf32>
    %77 = vector.shape_cast %76 : vector<8x8x64xf32> to vector<64x64xf32>
    %78 = vector.extract_strided_slice %73 {offsets = [0, 0, 0], sizes = [1, 64, 64], strides = [1, 1, 1]} : vector<5x64x64xf32> to vector<1x64x64xf32>
    %79 = vector.shape_cast %78 : vector<1x64x64xf32> to vector<64x64xf32>
    %cst_29 = arith.constant dense<0.000000e+00> : vector<64x64xf32>
    %80 = tpu.matmul %77, %79, %cst_29 {dimension_numbers = #tpu.dot_dimension_numbers<[1], [0], [0], [1], [0, 0, 1, 1], [], []>} : vector<64x64xf32>, vector<64x64xf32>, vector<64x64xf32> -> vector<64x64xf32>
    %81 = arith.addf %75, %80 : vector<64x64xf32>
    %82 = vector.extract_strided_slice %72 {offsets = [1, 0, 0], sizes = [8, 8, 64], strides = [1, 1, 1]} : vector<12x8x64xf32> to vector<8x8x64xf32>
    %83 = vector.shape_cast %82 : vector<8x8x64xf32> to vector<64x64xf32>
    %84 = vector.extract_strided_slice %73 {offsets = [1, 0, 0], sizes = [1, 64, 64], strides = [1, 1, 1]} : vector<5x64x64xf32> to vector<1x64x64xf32>
    %85 = vector.shape_cast %84 : vector<1x64x64xf32> to vector<64x64xf32>
    %cst_30 = arith.constant dense<0.000000e+00> : vector<64x64xf32>
    %86 = tpu.matmul %83, %85, %cst_30 {dimension_numbers = #tpu.dot_dimension_numbers<[1], [0], [0], [1], [0, 0, 1, 1], [], []>} : vector<64x64xf32>, vector<64x64xf32>, vector<64x64xf32> -> vector<64x64xf32>
    %87 = arith.addf %81, %86 : vector<64x64xf32>
    %88 = vector.extract_strided_slice %72 {offsets = [2, 0, 0], sizes = [8, 8, 64], strides = [1, 1, 1]} : vector<12x8x64xf32> to vector<8x8x64xf32>
    %89 = vector.shape_cast %88 : vector<8x8x64xf32> to vector<64x64xf32>
    %90 = vector.extract_strided_slice %73 {offsets = [2, 0, 0], sizes = [1, 64, 64], strides = [1, 1, 1]} : vector<5x64x64xf32> to vector<1x64x64xf32>
    %91 = vector.shape_cast %90 : vector<1x64x64xf32> to vector<64x64xf32>
    %cst_31 = arith.constant dense<0.000000e+00> : vector<64x64xf32>
    %92 = tpu.matmul %89, %91, %cst_31 {dimension_numbers = #tpu.dot_dimension_numbers<[1], [0], [0], [1], [0, 0, 1, 1], [], []>} : vector<64x64xf32>, vector<64x64xf32>, vector<64x64xf32> -> vector<64x64xf32>
    %93 = arith.addf %87, %92 : vector<64x64xf32>
    %94 = vector.extract_strided_slice %72 {offsets = [3, 0, 0], sizes = [8, 8, 64], strides = [1, 1, 1]} : vector<12x8x64xf32> to vector<8x8x64xf32>
    %95 = vector.shape_cast %94 : vector<8x8x64xf32> to vector<64x64xf32>
    %96 = vector.extract_strided_slice %73 {offsets = [3, 0, 0], sizes = [1, 64, 64], strides = [1, 1, 1]} : vector<5x64x64xf32> to vector<1x64x64xf32>
    %97 = vector.shape_cast %96 : vector<1x64x64xf32> to vector<64x64xf32>
    %cst_32 = arith.constant dense<0.000000e+00> : vector<64x64xf32>
    %98 = tpu.matmul %95, %97, %cst_32 {dimension_numbers = #tpu.dot_dimension_numbers<[1], [0], [0], [1], [0, 0, 1, 1], [], []>} : vector<64x64xf32>, vector<64x64xf32>, vector<64x64xf32> -> vector<64x64xf32>
    %99 = arith.addf %93, %98 : vector<64x64xf32>
    %100 = vector.extract_strided_slice %72 {offsets = [4, 0, 0], sizes = [8, 8, 64], strides = [1, 1, 1]} : vector<12x8x64xf32> to vector<8x8x64xf32>
    %101 = vector.shape_cast %100 : vector<8x8x64xf32> to vector<64x64xf32>
    %102 = vector.extract_strided_slice %73 {offsets = [4, 0, 0], sizes = [1, 64, 64], strides = [1, 1, 1]} : vector<5x64x64xf32> to vector<1x64x64xf32>
    %103 = vector.shape_cast %102 : vector<1x64x64xf32> to vector<64x64xf32>
    %cst_33 = arith.constant dense<0.000000e+00> : vector<64x64xf32>
    %104 = tpu.matmul %101, %103, %cst_33 {dimension_numbers = #tpu.dot_dimension_numbers<[1], [0], [0], [1], [0, 0, 1, 1], [], []>} : vector<64x64xf32>, vector<64x64xf32>, vector<64x64xf32> -> vector<64x64xf32>
    %105 = arith.addf %99, %104 : vector<64x64xf32>
    %106 = vector.broadcast %74 : vector<1x64xf32> to vector<64x64xf32>
    %107 = arith.addf %105, %106 : vector<64x64xf32>
    %108 = vector.shape_cast %107 : vector<64x64xf32> to vector<8x8x64xf32>
    %c0_34 = arith.constant 0 : index
    %c0_35 = arith.constant 0 : index
    %c0_36 = arith.constant 0 : index
    %109 = vector.load %arg8[%c0_34, %c0_35, %c0_36] : memref<8x8x64xf32, #tpu.memory_space<vmem>>, vector<8x8x64xf32>
    tpu.vector_store %arg8[%c0_34, %c0_35, %c0_36], %108 {strides = array<i32>} : memref<8x8x64xf32, #tpu.memory_space<vmem>>, vector<8x8x64xf32>,
    return
  }
  func.func @transform_0(%arg0: i32) -> (i32, i32, i32) {
    %c0_i32 = arith.constant 0 : i32
    %c0_i32_0 = arith.constant 0 : i32
    %c0_i32_1 = arith.constant 0 : i32
    return %c0_i32, %arg0, %c0_i32_0 : i32, i32, i32
  }
  func.func @transform_1(%arg0: i32) -> (i32, i32, i32) {
    %c0_i32 = arith.constant 0 : i32
    %c0_i32_0 = arith.constant 0 : i32
    %c0_i32_1 = arith.constant 0 : i32
    %c0_i32_2 = arith.constant 0 : i32
    return %c0_i32, %c0_i32_0, %c0_i32_1 : i32, i32, i32
  }
  func.func @transform_2(%arg0: i32) -> (i32, i32) {
    %c0_i32 = arith.constant 0 : i32
    %c0_i32_0 = arith.constant 0 : i32
    %c0_i32_1 = arith.constant 0 : i32
    return %c0_i32, %c0_i32_0 : i32, i32
  }
  func.func @transform_3(%arg0: i32) -> (i32, i32, i32) {
    %c0_i32 = arith.constant 0 : i32
    %c0_i32_0 = arith.constant 0 : i32
    %c0_i32_1 = arith.constant 0 : i32
    %c0_i32_2 = arith.constant 0 : i32
    return %c0_i32, %c0_i32_0, %c0_i32_1 : i32, i32, i32
  }
  func.func @transform_4(%arg0: i32) -> (i32, i32) {
    %c0_i32 = arith.constant 0 : i32
    %c0_i32_0 = arith.constant 0 : i32
    %c0_i32_1 = arith.constant 0 : i32
    return %c0_i32, %c0_i32_0 : i32, i32
  }
  func.func @transform_5(%arg0: i32) -> (i32, i32, i32) {
    %c0_i32 = arith.constant 0 : i32
    %c0_i32_0 = arith.constant 0 : i32
    %c0_i32_1 = arith.constant 0 : i32
    %c0_i32_2 = arith.constant 0 : i32
    return %c0_i32, %c0_i32_0, %c0_i32_1 : i32, i32, i32
  }
  func.func @transform_6(%arg0: i32) -> (i32, i32) {
    %c0_i32 = arith.constant 0 : i32
    %c0_i32_0 = arith.constant 0 : i32
    %c0_i32_1 = arith.constant 0 : i32
    return %c0_i32, %c0_i32_0 : i32, i32
  }
  func.func @transform_7(%arg0: i32) -> (i32, i32, i32) {
    %c0_i32 = arith.constant 0 : i32
    %c0_i32_0 = arith.constant 0 : i32
    %c0_i32_1 = arith.constant 0 : i32
    return %c0_i32, %arg0, %c0_i32_0 : i32, i32, i32
  }
}

module attributes {stable_mosaic.version = 11 : i64} {
  func.func @gru_rec_kernel(%arg0: i32, %arg1: memref<8x2x384xf32, #tpu.memory_space<vmem>>, %arg2: memref<128x384xf32, #tpu.memory_space<vmem>>, %arg3: memref<8x2x128xf32, #tpu.memory_space<vmem>>, %arg4: memref<2x128xf32, #tpu.memory_space<vmem>>) attributes {dimension_semantics = [#tpu.dimension_semantics<arbitrary>], iteration_bounds = array<i64: 1>, scalar_prefetch = 0 : i64, scratch_operands = 1 : i64, tpu.core_type = #tpu.core_type<tc>, window_params = [{transform_indices = @transform_0, window_bounds = array<i64: 8, 2, 384>}, {pipeline_mode = #tpu.pipeline_mode<synchronous>, transform_indices = @transform_1, window_bounds = array<i64: 128, 384>}, {transform_indices = @transform_2, window_bounds = array<i64: 8, 2, 128>}]} {
    %c0_i32 = arith.constant 0 : i32
    %0 = arith.cmpi eq, %arg0, %c0_i32 : i32
    %1 = arith.extui %0 : i1 to i32
    %c0_i32_0 = arith.constant 0 : i32
    %2 = arith.cmpi ne, %1, %c0_i32_0 : i32
    scf.if %2 {
      %cst_70 = arith.constant 0.000000e+00 : f32
      %278 = vector.broadcast %cst_70 : f32 to vector<2x128xf32>
      %c0_71 = arith.constant 0 : index
      %c0_72 = arith.constant 0 : index
      %279 = vector.load %arg4[%c0_71, %c0_72] : memref<2x128xf32, #tpu.memory_space<vmem>>, vector<2x128xf32>
      tpu.vector_store %arg4[%c0_71, %c0_72], %278 {strides = array<i32>} : memref<2x128xf32, #tpu.memory_space<vmem>>, vector<2x128xf32>,
    } else {
    }
    %c0 = arith.constant 0 : index
    %c0_1 = arith.constant 0 : index
    %3 = vector.load %arg2[%c0, %c0_1] : memref<128x384xf32, #tpu.memory_space<vmem>>, vector<128x384xf32>
    %c0_2 = arith.constant 0 : index
    %c0_3 = arith.constant 0 : index
    %4 = vector.load %arg4[%c0_2, %c0_3] : memref<2x128xf32, #tpu.memory_space<vmem>>, vector<2x128xf32>
    %c0_i32_4 = arith.constant 0 : i32
    %5 = arith.index_cast %c0_i32_4 : i32 to index
    %c0_5 = arith.constant 0 : index
    %c0_6 = arith.constant 0 : index
    %6 = vector.load %arg1[%5, %c0_5, %c0_6] : memref<8x2x384xf32, #tpu.memory_space<vmem>>, vector<1x2x384xf32>
    %7 = vector.shape_cast %6 : vector<1x2x384xf32> to vector<2x384xf32>
    %cst = arith.constant dense<0.000000e+00> : vector<2x384xf32>
    %8 = tpu.matmul %4, %3, %cst {dimension_numbers = #tpu.dot_dimension_numbers<[1], [0], [0], [1], [0, 0, 1, 1], [], []>} : vector<2x128xf32>, vector<128x384xf32>, vector<2x384xf32> -> vector<2x384xf32>
    %9 = vector.extract_strided_slice %7 {offsets = [0, 0], sizes = [2, 128], strides = [1, 1]} : vector<2x384xf32> to vector<2x128xf32>
    %10 = vector.extract_strided_slice %8 {offsets = [0, 0], sizes = [2, 128], strides = [1, 1]} : vector<2x384xf32> to vector<2x128xf32>
    %11 = arith.addf %9, %10 : vector<2x128xf32>
    %12 = arith.negf %11 : vector<2x128xf32>
    %13 = math.exp %12 : vector<2x128xf32>
    %cst_7 = arith.constant 1.000000e+00 : f32
    %14 = vector.broadcast %cst_7 : f32 to vector<2x128xf32>
    %15 = arith.addf %14, %13 : vector<2x128xf32>
    %16 = arith.divf %14, %15 : vector<2x128xf32>
    %17 = vector.extract_strided_slice %7 {offsets = [0, 128], sizes = [2, 128], strides = [1, 1]} : vector<2x384xf32> to vector<2x128xf32>
    %18 = vector.extract_strided_slice %8 {offsets = [0, 128], sizes = [2, 128], strides = [1, 1]} : vector<2x384xf32> to vector<2x128xf32>
    %19 = arith.addf %17, %18 : vector<2x128xf32>
    %20 = arith.negf %19 : vector<2x128xf32>
    %21 = math.exp %20 : vector<2x128xf32>
    %cst_8 = arith.constant 1.000000e+00 : f32
    %22 = vector.broadcast %cst_8 : f32 to vector<2x128xf32>
    %23 = arith.addf %22, %21 : vector<2x128xf32>
    %24 = arith.divf %22, %23 : vector<2x128xf32>
    %25 = vector.extract_strided_slice %7 {offsets = [0, 256], sizes = [2, 128], strides = [1, 1]} : vector<2x384xf32> to vector<2x128xf32>
    %26 = vector.extract_strided_slice %8 {offsets = [0, 256], sizes = [2, 128], strides = [1, 1]} : vector<2x384xf32> to vector<2x128xf32>
    %27 = arith.mulf %16, %26 : vector<2x128xf32>
    %28 = arith.addf %25, %27 : vector<2x128xf32>
    %29 = math.tanh %28 : vector<2x128xf32>
    %30 = arith.mulf %24, %4 : vector<2x128xf32>
    %cst_9 = arith.constant 1.000000e+00 : f32
    %31 = vector.broadcast %cst_9 : f32 to vector<2x128xf32>
    %32 = arith.subf %31, %24 : vector<2x128xf32>
    %33 = arith.mulf %32, %29 : vector<2x128xf32>
    %34 = arith.addf %30, %33 : vector<2x128xf32>
    %35 = arith.index_cast %c0_i32_4 : i32 to index
    %c0_10 = arith.constant 0 : index
    %c0_11 = arith.constant 0 : index
    %36 = vector.load %arg3[%35, %c0_10, %c0_11] : memref<8x2x128xf32, #tpu.memory_space<vmem>>, vector<1x2x128xf32>
    %37 = vector.shape_cast %36 : vector<1x2x128xf32> to vector<2x128xf32>
    %38 = vector.shape_cast %34 : vector<2x128xf32> to vector<1x2x128xf32>
    tpu.vector_store %arg3[%35, %c0_10, %c0_11], %38 {strides = array<i32>} : memref<8x2x128xf32, #tpu.memory_space<vmem>>, vector<1x2x128xf32>,
    %c1_i32 = arith.constant 1 : i32
    %39 = arith.index_cast %c1_i32 : i32 to index
    %c0_12 = arith.constant 0 : index
    %c0_13 = arith.constant 0 : index
    %40 = vector.load %arg1[%39, %c0_12, %c0_13] : memref<8x2x384xf32, #tpu.memory_space<vmem>>, vector<1x2x384xf32>
    %41 = vector.shape_cast %40 : vector<1x2x384xf32> to vector<2x384xf32>
    %cst_14 = arith.constant dense<0.000000e+00> : vector<2x384xf32>
    %42 = tpu.matmul %34, %3, %cst_14 {dimension_numbers = #tpu.dot_dimension_numbers<[1], [0], [0], [1], [0, 0, 1, 1], [], []>} : vector<2x128xf32>, vector<128x384xf32>, vector<2x384xf32> -> vector<2x384xf32>
    %43 = vector.extract_strided_slice %41 {offsets = [0, 0], sizes = [2, 128], strides = [1, 1]} : vector<2x384xf32> to vector<2x128xf32>
    %44 = vector.extract_strided_slice %42 {offsets = [0, 0], sizes = [2, 128], strides = [1, 1]} : vector<2x384xf32> to vector<2x128xf32>
    %45 = arith.addf %43, %44 : vector<2x128xf32>
    %46 = arith.negf %45 : vector<2x128xf32>
    %47 = math.exp %46 : vector<2x128xf32>
    %cst_15 = arith.constant 1.000000e+00 : f32
    %48 = vector.broadcast %cst_15 : f32 to vector<2x128xf32>
    %49 = arith.addf %48, %47 : vector<2x128xf32>
    %50 = arith.divf %48, %49 : vector<2x128xf32>
    %51 = vector.extract_strided_slice %41 {offsets = [0, 128], sizes = [2, 128], strides = [1, 1]} : vector<2x384xf32> to vector<2x128xf32>
    %52 = vector.extract_strided_slice %42 {offsets = [0, 128], sizes = [2, 128], strides = [1, 1]} : vector<2x384xf32> to vector<2x128xf32>
    %53 = arith.addf %51, %52 : vector<2x128xf32>
    %54 = arith.negf %53 : vector<2x128xf32>
    %55 = math.exp %54 : vector<2x128xf32>
    %cst_16 = arith.constant 1.000000e+00 : f32
    %56 = vector.broadcast %cst_16 : f32 to vector<2x128xf32>
    %57 = arith.addf %56, %55 : vector<2x128xf32>
    %58 = arith.divf %56, %57 : vector<2x128xf32>
    %59 = vector.extract_strided_slice %41 {offsets = [0, 256], sizes = [2, 128], strides = [1, 1]} : vector<2x384xf32> to vector<2x128xf32>
    %60 = vector.extract_strided_slice %42 {offsets = [0, 256], sizes = [2, 128], strides = [1, 1]} : vector<2x384xf32> to vector<2x128xf32>
    %61 = arith.mulf %50, %60 : vector<2x128xf32>
    %62 = arith.addf %59, %61 : vector<2x128xf32>
    %63 = math.tanh %62 : vector<2x128xf32>
    %64 = arith.mulf %58, %34 : vector<2x128xf32>
    %cst_17 = arith.constant 1.000000e+00 : f32
    %65 = vector.broadcast %cst_17 : f32 to vector<2x128xf32>
    %66 = arith.subf %65, %58 : vector<2x128xf32>
    %67 = arith.mulf %66, %63 : vector<2x128xf32>
    %68 = arith.addf %64, %67 : vector<2x128xf32>
    %69 = arith.index_cast %c1_i32 : i32 to index
    %c0_18 = arith.constant 0 : index
    %c0_19 = arith.constant 0 : index
    %70 = vector.load %arg3[%69, %c0_18, %c0_19] : memref<8x2x128xf32, #tpu.memory_space<vmem>>, vector<1x2x128xf32>
    %71 = vector.shape_cast %70 : vector<1x2x128xf32> to vector<2x128xf32>
    %72 = vector.shape_cast %68 : vector<2x128xf32> to vector<1x2x128xf32>
    tpu.vector_store %arg3[%69, %c0_18, %c0_19], %72 {strides = array<i32>} : memref<8x2x128xf32, #tpu.memory_space<vmem>>, vector<1x2x128xf32>,
    %c2_i32 = arith.constant 2 : i32
    %73 = arith.index_cast %c2_i32 : i32 to index
    %c0_20 = arith.constant 0 : index
    %c0_21 = arith.constant 0 : index
    %74 = vector.load %arg1[%73, %c0_20, %c0_21] : memref<8x2x384xf32, #tpu.memory_space<vmem>>, vector<1x2x384xf32>
    %75 = vector.shape_cast %74 : vector<1x2x384xf32> to vector<2x384xf32>
    %cst_22 = arith.constant dense<0.000000e+00> : vector<2x384xf32>
    %76 = tpu.matmul %68, %3, %cst_22 {dimension_numbers = #tpu.dot_dimension_numbers<[1], [0], [0], [1], [0, 0, 1, 1], [], []>} : vector<2x128xf32>, vector<128x384xf32>, vector<2x384xf32> -> vector<2x384xf32>
    %77 = vector.extract_strided_slice %75 {offsets = [0, 0], sizes = [2, 128], strides = [1, 1]} : vector<2x384xf32> to vector<2x128xf32>
    %78 = vector.extract_strided_slice %76 {offsets = [0, 0], sizes = [2, 128], strides = [1, 1]} : vector<2x384xf32> to vector<2x128xf32>
    %79 = arith.addf %77, %78 : vector<2x128xf32>
    %80 = arith.negf %79 : vector<2x128xf32>
    %81 = math.exp %80 : vector<2x128xf32>
    %cst_23 = arith.constant 1.000000e+00 : f32
    %82 = vector.broadcast %cst_23 : f32 to vector<2x128xf32>
    %83 = arith.addf %82, %81 : vector<2x128xf32>
    %84 = arith.divf %82, %83 : vector<2x128xf32>
    %85 = vector.extract_strided_slice %75 {offsets = [0, 128], sizes = [2, 128], strides = [1, 1]} : vector<2x384xf32> to vector<2x128xf32>
    %86 = vector.extract_strided_slice %76 {offsets = [0, 128], sizes = [2, 128], strides = [1, 1]} : vector<2x384xf32> to vector<2x128xf32>
    %87 = arith.addf %85, %86 : vector<2x128xf32>
    %88 = arith.negf %87 : vector<2x128xf32>
    %89 = math.exp %88 : vector<2x128xf32>
    %cst_24 = arith.constant 1.000000e+00 : f32
    %90 = vector.broadcast %cst_24 : f32 to vector<2x128xf32>
    %91 = arith.addf %90, %89 : vector<2x128xf32>
    %92 = arith.divf %90, %91 : vector<2x128xf32>
    %93 = vector.extract_strided_slice %75 {offsets = [0, 256], sizes = [2, 128], strides = [1, 1]} : vector<2x384xf32> to vector<2x128xf32>
    %94 = vector.extract_strided_slice %76 {offsets = [0, 256], sizes = [2, 128], strides = [1, 1]} : vector<2x384xf32> to vector<2x128xf32>
    %95 = arith.mulf %84, %94 : vector<2x128xf32>
    %96 = arith.addf %93, %95 : vector<2x128xf32>
    %97 = math.tanh %96 : vector<2x128xf32>
    %98 = arith.mulf %92, %68 : vector<2x128xf32>
    %cst_25 = arith.constant 1.000000e+00 : f32
    %99 = vector.broadcast %cst_25 : f32 to vector<2x128xf32>
    %100 = arith.subf %99, %92 : vector<2x128xf32>
    %101 = arith.mulf %100, %97 : vector<2x128xf32>
    %102 = arith.addf %98, %101 : vector<2x128xf32>
    %103 = arith.index_cast %c2_i32 : i32 to index
    %c0_26 = arith.constant 0 : index
    %c0_27 = arith.constant 0 : index
    %104 = vector.load %arg3[%103, %c0_26, %c0_27] : memref<8x2x128xf32, #tpu.memory_space<vmem>>, vector<1x2x128xf32>
    %105 = vector.shape_cast %104 : vector<1x2x128xf32> to vector<2x128xf32>
    %106 = vector.shape_cast %102 : vector<2x128xf32> to vector<1x2x128xf32>
    tpu.vector_store %arg3[%103, %c0_26, %c0_27], %106 {strides = array<i32>} : memref<8x2x128xf32, #tpu.memory_space<vmem>>, vector<1x2x128xf32>,
    %c3_i32 = arith.constant 3 : i32
    %107 = arith.index_cast %c3_i32 : i32 to index
    %c0_28 = arith.constant 0 : index
    %c0_29 = arith.constant 0 : index
    %108 = vector.load %arg1[%107, %c0_28, %c0_29] : memref<8x2x384xf32, #tpu.memory_space<vmem>>, vector<1x2x384xf32>
    %109 = vector.shape_cast %108 : vector<1x2x384xf32> to vector<2x384xf32>
    %cst_30 = arith.constant dense<0.000000e+00> : vector<2x384xf32>
    %110 = tpu.matmul %102, %3, %cst_30 {dimension_numbers = #tpu.dot_dimension_numbers<[1], [0], [0], [1], [0, 0, 1, 1], [], []>} : vector<2x128xf32>, vector<128x384xf32>, vector<2x384xf32> -> vector<2x384xf32>
    %111 = vector.extract_strided_slice %109 {offsets = [0, 0], sizes = [2, 128], strides = [1, 1]} : vector<2x384xf32> to vector<2x128xf32>
    %112 = vector.extract_strided_slice %110 {offsets = [0, 0], sizes = [2, 128], strides = [1, 1]} : vector<2x384xf32> to vector<2x128xf32>
    %113 = arith.addf %111, %112 : vector<2x128xf32>
    %114 = arith.negf %113 : vector<2x128xf32>
    %115 = math.exp %114 : vector<2x128xf32>
    %cst_31 = arith.constant 1.000000e+00 : f32
    %116 = vector.broadcast %cst_31 : f32 to vector<2x128xf32>
    %117 = arith.addf %116, %115 : vector<2x128xf32>
    %118 = arith.divf %116, %117 : vector<2x128xf32>
    %119 = vector.extract_strided_slice %109 {offsets = [0, 128], sizes = [2, 128], strides = [1, 1]} : vector<2x384xf32> to vector<2x128xf32>
    %120 = vector.extract_strided_slice %110 {offsets = [0, 128], sizes = [2, 128], strides = [1, 1]} : vector<2x384xf32> to vector<2x128xf32>
    %121 = arith.addf %119, %120 : vector<2x128xf32>
    %122 = arith.negf %121 : vector<2x128xf32>
    %123 = math.exp %122 : vector<2x128xf32>
    %cst_32 = arith.constant 1.000000e+00 : f32
    %124 = vector.broadcast %cst_32 : f32 to vector<2x128xf32>
    %125 = arith.addf %124, %123 : vector<2x128xf32>
    %126 = arith.divf %124, %125 : vector<2x128xf32>
    %127 = vector.extract_strided_slice %109 {offsets = [0, 256], sizes = [2, 128], strides = [1, 1]} : vector<2x384xf32> to vector<2x128xf32>
    %128 = vector.extract_strided_slice %110 {offsets = [0, 256], sizes = [2, 128], strides = [1, 1]} : vector<2x384xf32> to vector<2x128xf32>
    %129 = arith.mulf %118, %128 : vector<2x128xf32>
    %130 = arith.addf %127, %129 : vector<2x128xf32>
    %131 = math.tanh %130 : vector<2x128xf32>
    %132 = arith.mulf %126, %102 : vector<2x128xf32>
    %cst_33 = arith.constant 1.000000e+00 : f32
    %133 = vector.broadcast %cst_33 : f32 to vector<2x128xf32>
    %134 = arith.subf %133, %126 : vector<2x128xf32>
    %135 = arith.mulf %134, %131 : vector<2x128xf32>
    %136 = arith.addf %132, %135 : vector<2x128xf32>
    %137 = arith.index_cast %c3_i32 : i32 to index
    %c0_34 = arith.constant 0 : index
    %c0_35 = arith.constant 0 : index
    %138 = vector.load %arg3[%137, %c0_34, %c0_35] : memref<8x2x128xf32, #tpu.memory_space<vmem>>, vector<1x2x128xf32>
    %139 = vector.shape_cast %138 : vector<1x2x128xf32> to vector<2x128xf32>
    %140 = vector.shape_cast %136 : vector<2x128xf32> to vector<1x2x128xf32>
    tpu.vector_store %arg3[%137, %c0_34, %c0_35], %140 {strides = array<i32>} : memref<8x2x128xf32, #tpu.memory_space<vmem>>, vector<1x2x128xf32>,
    %c4_i32 = arith.constant 4 : i32
    %141 = arith.index_cast %c4_i32 : i32 to index
    %c0_36 = arith.constant 0 : index
    %c0_37 = arith.constant 0 : index
    %142 = vector.load %arg1[%141, %c0_36, %c0_37] : memref<8x2x384xf32, #tpu.memory_space<vmem>>, vector<1x2x384xf32>
    %143 = vector.shape_cast %142 : vector<1x2x384xf32> to vector<2x384xf32>
    %cst_38 = arith.constant dense<0.000000e+00> : vector<2x384xf32>
    %144 = tpu.matmul %136, %3, %cst_38 {dimension_numbers = #tpu.dot_dimension_numbers<[1], [0], [0], [1], [0, 0, 1, 1], [], []>} : vector<2x128xf32>, vector<128x384xf32>, vector<2x384xf32> -> vector<2x384xf32>
    %145 = vector.extract_strided_slice %143 {offsets = [0, 0], sizes = [2, 128], strides = [1, 1]} : vector<2x384xf32> to vector<2x128xf32>
    %146 = vector.extract_strided_slice %144 {offsets = [0, 0], sizes = [2, 128], strides = [1, 1]} : vector<2x384xf32> to vector<2x128xf32>
    %147 = arith.addf %145, %146 : vector<2x128xf32>
    %148 = arith.negf %147 : vector<2x128xf32>
    %149 = math.exp %148 : vector<2x128xf32>
    %cst_39 = arith.constant 1.000000e+00 : f32
    %150 = vector.broadcast %cst_39 : f32 to vector<2x128xf32>
    %151 = arith.addf %150, %149 : vector<2x128xf32>
    %152 = arith.divf %150, %151 : vector<2x128xf32>
    %153 = vector.extract_strided_slice %143 {offsets = [0, 128], sizes = [2, 128], strides = [1, 1]} : vector<2x384xf32> to vector<2x128xf32>
    %154 = vector.extract_strided_slice %144 {offsets = [0, 128], sizes = [2, 128], strides = [1, 1]} : vector<2x384xf32> to vector<2x128xf32>
    %155 = arith.addf %153, %154 : vector<2x128xf32>
    %156 = arith.negf %155 : vector<2x128xf32>
    %157 = math.exp %156 : vector<2x128xf32>
    %cst_40 = arith.constant 1.000000e+00 : f32
    %158 = vector.broadcast %cst_40 : f32 to vector<2x128xf32>
    %159 = arith.addf %158, %157 : vector<2x128xf32>
    %160 = arith.divf %158, %159 : vector<2x128xf32>
    %161 = vector.extract_strided_slice %143 {offsets = [0, 256], sizes = [2, 128], strides = [1, 1]} : vector<2x384xf32> to vector<2x128xf32>
    %162 = vector.extract_strided_slice %144 {offsets = [0, 256], sizes = [2, 128], strides = [1, 1]} : vector<2x384xf32> to vector<2x128xf32>
    %163 = arith.mulf %152, %162 : vector<2x128xf32>
    %164 = arith.addf %161, %163 : vector<2x128xf32>
    %165 = math.tanh %164 : vector<2x128xf32>
    %166 = arith.mulf %160, %136 : vector<2x128xf32>
    %cst_41 = arith.constant 1.000000e+00 : f32
    %167 = vector.broadcast %cst_41 : f32 to vector<2x128xf32>
    %168 = arith.subf %167, %160 : vector<2x128xf32>
    %169 = arith.mulf %168, %165 : vector<2x128xf32>
    %170 = arith.addf %166, %169 : vector<2x128xf32>
    %171 = arith.index_cast %c4_i32 : i32 to index
    %c0_42 = arith.constant 0 : index
    %c0_43 = arith.constant 0 : index
    %172 = vector.load %arg3[%171, %c0_42, %c0_43] : memref<8x2x128xf32, #tpu.memory_space<vmem>>, vector<1x2x128xf32>
    %173 = vector.shape_cast %172 : vector<1x2x128xf32> to vector<2x128xf32>
    %174 = vector.shape_cast %170 : vector<2x128xf32> to vector<1x2x128xf32>
    tpu.vector_store %arg3[%171, %c0_42, %c0_43], %174 {strides = array<i32>} : memref<8x2x128xf32, #tpu.memory_space<vmem>>, vector<1x2x128xf32>,
    %c5_i32 = arith.constant 5 : i32
    %175 = arith.index_cast %c5_i32 : i32 to index
    %c0_44 = arith.constant 0 : index
    %c0_45 = arith.constant 0 : index
    %176 = vector.load %arg1[%175, %c0_44, %c0_45] : memref<8x2x384xf32, #tpu.memory_space<vmem>>, vector<1x2x384xf32>
    %177 = vector.shape_cast %176 : vector<1x2x384xf32> to vector<2x384xf32>
    %cst_46 = arith.constant dense<0.000000e+00> : vector<2x384xf32>
    %178 = tpu.matmul %170, %3, %cst_46 {dimension_numbers = #tpu.dot_dimension_numbers<[1], [0], [0], [1], [0, 0, 1, 1], [], []>} : vector<2x128xf32>, vector<128x384xf32>, vector<2x384xf32> -> vector<2x384xf32>
    %179 = vector.extract_strided_slice %177 {offsets = [0, 0], sizes = [2, 128], strides = [1, 1]} : vector<2x384xf32> to vector<2x128xf32>
    %180 = vector.extract_strided_slice %178 {offsets = [0, 0], sizes = [2, 128], strides = [1, 1]} : vector<2x384xf32> to vector<2x128xf32>
    %181 = arith.addf %179, %180 : vector<2x128xf32>
    %182 = arith.negf %181 : vector<2x128xf32>
    %183 = math.exp %182 : vector<2x128xf32>
    %cst_47 = arith.constant 1.000000e+00 : f32
    %184 = vector.broadcast %cst_47 : f32 to vector<2x128xf32>
    %185 = arith.addf %184, %183 : vector<2x128xf32>
    %186 = arith.divf %184, %185 : vector<2x128xf32>
    %187 = vector.extract_strided_slice %177 {offsets = [0, 128], sizes = [2, 128], strides = [1, 1]} : vector<2x384xf32> to vector<2x128xf32>
    %188 = vector.extract_strided_slice %178 {offsets = [0, 128], sizes = [2, 128], strides = [1, 1]} : vector<2x384xf32> to vector<2x128xf32>
    %189 = arith.addf %187, %188 : vector<2x128xf32>
    %190 = arith.negf %189 : vector<2x128xf32>
    %191 = math.exp %190 : vector<2x128xf32>
    %cst_48 = arith.constant 1.000000e+00 : f32
    %192 = vector.broadcast %cst_48 : f32 to vector<2x128xf32>
    %193 = arith.addf %192, %191 : vector<2x128xf32>
    %194 = arith.divf %192, %193 : vector<2x128xf32>
    %195 = vector.extract_strided_slice %177 {offsets = [0, 256], sizes = [2, 128], strides = [1, 1]} : vector<2x384xf32> to vector<2x128xf32>
    %196 = vector.extract_strided_slice %178 {offsets = [0, 256], sizes = [2, 128], strides = [1, 1]} : vector<2x384xf32> to vector<2x128xf32>
    %197 = arith.mulf %186, %196 : vector<2x128xf32>
    %198 = arith.addf %195, %197 : vector<2x128xf32>
    %199 = math.tanh %198 : vector<2x128xf32>
    %200 = arith.mulf %194, %170 : vector<2x128xf32>
    %cst_49 = arith.constant 1.000000e+00 : f32
    %201 = vector.broadcast %cst_49 : f32 to vector<2x128xf32>
    %202 = arith.subf %201, %194 : vector<2x128xf32>
    %203 = arith.mulf %202, %199 : vector<2x128xf32>
    %204 = arith.addf %200, %203 : vector<2x128xf32>
    %205 = arith.index_cast %c5_i32 : i32 to index
    %c0_50 = arith.constant 0 : index
    %c0_51 = arith.constant 0 : index
    %206 = vector.load %arg3[%205, %c0_50, %c0_51] : memref<8x2x128xf32, #tpu.memory_space<vmem>>, vector<1x2x128xf32>
    %207 = vector.shape_cast %206 : vector<1x2x128xf32> to vector<2x128xf32>
    %208 = vector.shape_cast %204 : vector<2x128xf32> to vector<1x2x128xf32>
    tpu.vector_store %arg3[%205, %c0_50, %c0_51], %208 {strides = array<i32>} : memref<8x2x128xf32, #tpu.memory_space<vmem>>, vector<1x2x128xf32>,
    %c6_i32 = arith.constant 6 : i32
    %209 = arith.index_cast %c6_i32 : i32 to index
    %c0_52 = arith.constant 0 : index
    %c0_53 = arith.constant 0 : index
    %210 = vector.load %arg1[%209, %c0_52, %c0_53] : memref<8x2x384xf32, #tpu.memory_space<vmem>>, vector<1x2x384xf32>
    %211 = vector.shape_cast %210 : vector<1x2x384xf32> to vector<2x384xf32>
    %cst_54 = arith.constant dense<0.000000e+00> : vector<2x384xf32>
    %212 = tpu.matmul %204, %3, %cst_54 {dimension_numbers = #tpu.dot_dimension_numbers<[1], [0], [0], [1], [0, 0, 1, 1], [], []>} : vector<2x128xf32>, vector<128x384xf32>, vector<2x384xf32> -> vector<2x384xf32>
    %213 = vector.extract_strided_slice %211 {offsets = [0, 0], sizes = [2, 128], strides = [1, 1]} : vector<2x384xf32> to vector<2x128xf32>
    %214 = vector.extract_strided_slice %212 {offsets = [0, 0], sizes = [2, 128], strides = [1, 1]} : vector<2x384xf32> to vector<2x128xf32>
    %215 = arith.addf %213, %214 : vector<2x128xf32>
    %216 = arith.negf %215 : vector<2x128xf32>
    %217 = math.exp %216 : vector<2x128xf32>
    %cst_55 = arith.constant 1.000000e+00 : f32
    %218 = vector.broadcast %cst_55 : f32 to vector<2x128xf32>
    %219 = arith.addf %218, %217 : vector<2x128xf32>
    %220 = arith.divf %218, %219 : vector<2x128xf32>
    %221 = vector.extract_strided_slice %211 {offsets = [0, 128], sizes = [2, 128], strides = [1, 1]} : vector<2x384xf32> to vector<2x128xf32>
    %222 = vector.extract_strided_slice %212 {offsets = [0, 128], sizes = [2, 128], strides = [1, 1]} : vector<2x384xf32> to vector<2x128xf32>
    %223 = arith.addf %221, %222 : vector<2x128xf32>
    %224 = arith.negf %223 : vector<2x128xf32>
    %225 = math.exp %224 : vector<2x128xf32>
    %cst_56 = arith.constant 1.000000e+00 : f32
    %226 = vector.broadcast %cst_56 : f32 to vector<2x128xf32>
    %227 = arith.addf %226, %225 : vector<2x128xf32>
    %228 = arith.divf %226, %227 : vector<2x128xf32>
    %229 = vector.extract_strided_slice %211 {offsets = [0, 256], sizes = [2, 128], strides = [1, 1]} : vector<2x384xf32> to vector<2x128xf32>
    %230 = vector.extract_strided_slice %212 {offsets = [0, 256], sizes = [2, 128], strides = [1, 1]} : vector<2x384xf32> to vector<2x128xf32>
    %231 = arith.mulf %220, %230 : vector<2x128xf32>
    %232 = arith.addf %229, %231 : vector<2x128xf32>
    %233 = math.tanh %232 : vector<2x128xf32>
    %234 = arith.mulf %228, %204 : vector<2x128xf32>
    %cst_57 = arith.constant 1.000000e+00 : f32
    %235 = vector.broadcast %cst_57 : f32 to vector<2x128xf32>
    %236 = arith.subf %235, %228 : vector<2x128xf32>
    %237 = arith.mulf %236, %233 : vector<2x128xf32>
    %238 = arith.addf %234, %237 : vector<2x128xf32>
    %239 = arith.index_cast %c6_i32 : i32 to index
    %c0_58 = arith.constant 0 : index
    %c0_59 = arith.constant 0 : index
    %240 = vector.load %arg3[%239, %c0_58, %c0_59] : memref<8x2x128xf32, #tpu.memory_space<vmem>>, vector<1x2x128xf32>
    %241 = vector.shape_cast %240 : vector<1x2x128xf32> to vector<2x128xf32>
    %242 = vector.shape_cast %238 : vector<2x128xf32> to vector<1x2x128xf32>
    tpu.vector_store %arg3[%239, %c0_58, %c0_59], %242 {strides = array<i32>} : memref<8x2x128xf32, #tpu.memory_space<vmem>>, vector<1x2x128xf32>,
    %c7_i32 = arith.constant 7 : i32
    %243 = arith.index_cast %c7_i32 : i32 to index
    %c0_60 = arith.constant 0 : index
    %c0_61 = arith.constant 0 : index
    %244 = vector.load %arg1[%243, %c0_60, %c0_61] : memref<8x2x384xf32, #tpu.memory_space<vmem>>, vector<1x2x384xf32>
    %245 = vector.shape_cast %244 : vector<1x2x384xf32> to vector<2x384xf32>
    %cst_62 = arith.constant dense<0.000000e+00> : vector<2x384xf32>
    %246 = tpu.matmul %238, %3, %cst_62 {dimension_numbers = #tpu.dot_dimension_numbers<[1], [0], [0], [1], [0, 0, 1, 1], [], []>} : vector<2x128xf32>, vector<128x384xf32>, vector<2x384xf32> -> vector<2x384xf32>
    %247 = vector.extract_strided_slice %245 {offsets = [0, 0], sizes = [2, 128], strides = [1, 1]} : vector<2x384xf32> to vector<2x128xf32>
    %248 = vector.extract_strided_slice %246 {offsets = [0, 0], sizes = [2, 128], strides = [1, 1]} : vector<2x384xf32> to vector<2x128xf32>
    %249 = arith.addf %247, %248 : vector<2x128xf32>
    %250 = arith.negf %249 : vector<2x128xf32>
    %251 = math.exp %250 : vector<2x128xf32>
    %cst_63 = arith.constant 1.000000e+00 : f32
    %252 = vector.broadcast %cst_63 : f32 to vector<2x128xf32>
    %253 = arith.addf %252, %251 : vector<2x128xf32>
    %254 = arith.divf %252, %253 : vector<2x128xf32>
    %255 = vector.extract_strided_slice %245 {offsets = [0, 128], sizes = [2, 128], strides = [1, 1]} : vector<2x384xf32> to vector<2x128xf32>
    %256 = vector.extract_strided_slice %246 {offsets = [0, 128], sizes = [2, 128], strides = [1, 1]} : vector<2x384xf32> to vector<2x128xf32>
    %257 = arith.addf %255, %256 : vector<2x128xf32>
    %258 = arith.negf %257 : vector<2x128xf32>
    %259 = math.exp %258 : vector<2x128xf32>
    %cst_64 = arith.constant 1.000000e+00 : f32
    %260 = vector.broadcast %cst_64 : f32 to vector<2x128xf32>
    %261 = arith.addf %260, %259 : vector<2x128xf32>
    %262 = arith.divf %260, %261 : vector<2x128xf32>
    %263 = vector.extract_strided_slice %245 {offsets = [0, 256], sizes = [2, 128], strides = [1, 1]} : vector<2x384xf32> to vector<2x128xf32>
    %264 = vector.extract_strided_slice %246 {offsets = [0, 256], sizes = [2, 128], strides = [1, 1]} : vector<2x384xf32> to vector<2x128xf32>
    %265 = arith.mulf %254, %264 : vector<2x128xf32>
    %266 = arith.addf %263, %265 : vector<2x128xf32>
    %267 = math.tanh %266 : vector<2x128xf32>
    %268 = arith.mulf %262, %238 : vector<2x128xf32>
    %cst_65 = arith.constant 1.000000e+00 : f32
    %269 = vector.broadcast %cst_65 : f32 to vector<2x128xf32>
    %270 = arith.subf %269, %262 : vector<2x128xf32>
    %271 = arith.mulf %270, %267 : vector<2x128xf32>
    %272 = arith.addf %268, %271 : vector<2x128xf32>
    %273 = arith.index_cast %c7_i32 : i32 to index
    %c0_66 = arith.constant 0 : index
    %c0_67 = arith.constant 0 : index
    %274 = vector.load %arg3[%273, %c0_66, %c0_67] : memref<8x2x128xf32, #tpu.memory_space<vmem>>, vector<1x2x128xf32>
    %275 = vector.shape_cast %274 : vector<1x2x128xf32> to vector<2x128xf32>
    %276 = vector.shape_cast %272 : vector<2x128xf32> to vector<1x2x128xf32>
    tpu.vector_store %arg3[%273, %c0_66, %c0_67], %276 {strides = array<i32>} : memref<8x2x128xf32, #tpu.memory_space<vmem>>, vector<1x2x128xf32>,
    %c8_i32 = arith.constant 8 : i32
    %c0_68 = arith.constant 0 : index
    %c0_69 = arith.constant 0 : index
    %277 = vector.load %arg4[%c0_68, %c0_69] : memref<2x128xf32, #tpu.memory_space<vmem>>, vector<2x128xf32>
    tpu.vector_store %arg4[%c0_68, %c0_69], %272 {strides = array<i32>} : memref<2x128xf32, #tpu.memory_space<vmem>>, vector<2x128xf32>,
    return
  }
  func.func @transform_0(%arg0: i32) -> (i32, i32, i32) {
    %c0_i32 = arith.constant 0 : i32
    %c0_i32_0 = arith.constant 0 : i32
    %c0_i32_1 = arith.constant 0 : i32
    return %arg0, %c0_i32, %c0_i32_0 : i32, i32, i32
  }
  func.func @transform_1(%arg0: i32) -> (i32, i32) {
    %c0_i32 = arith.constant 0 : i32
    %c0_i32_0 = arith.constant 0 : i32
    %c0_i32_1 = arith.constant 0 : i32
    return %c0_i32, %c0_i32_0 : i32, i32
  }
  func.func @transform_2(%arg0: i32) -> (i32, i32, i32) {
    %c0_i32 = arith.constant 0 : i32
    %c0_i32_0 = arith.constant 0 : i32
    %c0_i32_1 = arith.constant 0 : i32
    return %arg0, %c0_i32, %c0_i32_0 : i32, i32, i32
  }
}

</mosaic_0001>

<bundles_post_ra>
// kernel: deep_conv_gru_forward.4
= control target key start
LH: loop header
LB: loop body
LE: loop exit
PB: predicated region body
PF: predicated region fallthrough
CT: control target
= control target key end

     0   :  { %v2413_v3 = vmov 0.0|0.0   ;;  %v2414_v4 = vmov 0.0   ;;  %vm2415_vm0 = vmmov 0   ;;  %s2987_s1 = inlined_call_operand.vmem [shape: f32[128,384], index: 1, kind: input, shape index: {}]   ;;  %s2988_s0 = inlined_call_operand.vmem [shape: f32[8,2,384], index: 0, kind: input, shape index: {}]   ;;  %s2989_s2 = inlined_call_operand.vmem [shape: f32[8,2,128], index: 2, kind: output, shape index: {}]  }
   0x1   :  { %v17_v0 = vld [vmem:[%s2987_s1 + $0x8] sm:$0xff]  ;;  %v20_v1 = vld [vmem:[%s2987_s1 + $0x20] sm:$0xff]  ;;  %1914 = vmatprep.subr.bf16.mxu1 %v2413_v3  ;;  %130 = vmatprep.mubr.f32.mxu0 %v2414_v4  ;;  %15 = vst [vmem:[#allocation2] sm:$0x3] %v2414_v4  ;;  %v19_v6 = vld [vmem:[%s2987_s1 + $0x18] sm:$0xff] }
   0x2   :  { %v16_v2 = vld [vmem:[%s2987_s1] sm:$0xff]  ;;  %v2443_v5 = vpack.c.bf16 %v20_v1, %v17_v0  ;;  %v23_v7 = vld [vmem:[%s2987_s1 + $0x38] sm:$0xff]  ;;  %v26_v8 = vld [vmem:[%s2987_s1 + $0x50] sm:$0xff]  ;;  %1634 = vmatprep.mubr.msk.f32.mxu1 %vm2415_vm0, %v2414_v4 }
   0x3   :  { %v2456_v9 = vpack.c.bf16 %v19_v6, %v16_v2  ;;  %v2458_v10 = vpack.c.bf16 %v26_v8, %v23_v7  ;;  %v22_v11 = vld [vmem:[%s2987_s1 + $0x30] sm:$0xff]  ;;  %v25_v12 = vld [vmem:[%s2987_s1 + $0x48] sm:$0xff]  ;;  %v32_v14 = vld [vmem:[%s2987_s1 + $0x80] sm:$0xff] }
   0x4   :  { %v29_v13 = vld [vmem:[%s2987_s1 + $0x68] sm:$0xff]  ;;  %1883 = vmatprep.subr.bf16.mxu0 %v2443_v5  ;;  %v2474_v15 = vpack.c.bf16 %v25_v12, %v22_v11  ;;  %v28_v17 = vld [vmem:[%s2987_s1 + $0x60] sm:$0xff]  ;;  %v31_v18 = vld [vmem:[%s2987_s1 + $0x78] sm:$0xff] }
   0x5   :  { %1885 = vmatpush1.bf16.msra.mxu0 %v2456_v9  ;;  %v2477_v16 = vpack.c.bf16 %v32_v14, %v29_v13  ;;  %v35_v19 = vld [vmem:[%s2987_s1 + $0x98] sm:$0xff]  ;;  %v38_v20 = vld [vmem:[%s2987_s1 + $0xb0] sm:$0xff]  ;;  %v2492_v21 = vpack.c.bf16 %v31_v18, %v28_v17  ;;  %v37_v24 = vld [vmem:[%s2987_s1 + $0xa8] sm:$0xff] }
   0x6   :  { %1887 = vmatprep.subr.bf16.mxu0 %v2458_v10  ;;  %v2495_v22 = vpack.c.bf16 %v38_v20, %v35_v19  ;;  %v34_v23 = vld [vmem:[%s2987_s1 + $0x90] sm:$0xff]  ;;  %v41_v25 = vld [vmem:[%s2987_s1 + $0xc8] sm:$0xff]  ;;  %v44_v26 = vld [vmem:[%s2987_s1 + $0xe0] sm:$0xff] }
   0x7   :  { %v18_v27 = vld [vmem:[%s2987_s1 + $0x10] sm:$0xff]  ;;  %v21_v28 = vld [vmem:[%s2987_s1 + $0x28] sm:$0xff]  ;;  %v24_v30 = vld [vmem:[%s2987_s1 + $0x40] sm:$0xff]  ;;  %v2521_v31 = vpack.c.bf16 %v37_v24, %v34_v23  ;;  %v2527_v33 = vpack.c.bf16 %v44_v26, %v41_v25 }
   0x8   :  { %v2515_v29 = vpack.c.bf16 %v21_v28, %v18_v27  ;;  %v27_v32 = vld [vmem:[%s2987_s1 + $0x58] sm:$0xff]  ;;  %v40_v34 = vld [vmem:[%s2987_s1 + $0xc0] sm:$0xff]  ;;  %v50_v38 = vld [vmem:[%s2987_s1 + $0x110] sm:$0xff] }
   0x9   :  { %1889 = vmatpush1.bf16.msra.mxu0 %v2474_v15  ;;  %v43_v35 = vld [vmem:[%s2987_s1 + $0xd8] sm:$0xff]  ;;  %v2539_v37 = vpack.c.bf16 %v27_v32, %v24_v30  ;;  %v30_v39 = vld [vmem:[%s2987_s1 + $0x70] sm:$0xff]  ;;  %v33_v40 = vld [vmem:[%s2987_s1 + $0x88] sm:$0xff] }
   0xa   :  { %1891 = vmatprep.subr.bf16.mxu0 %v2477_v16  ;;  %v47_v36 = vld [vmem:[%s2987_s1 + $0xf8] sm:$0xff]  ;;  %1916 = vmatpush3.bf16.msra.mxu1 %v2515_v29  ;;  %v2552_v41 = vpack.c.bf16 %v43_v35, %v40_v34  ;;  %v46_v43 = vld [vmem:[%s2987_s1 + $0xf0] sm:$0xff]  ;;  %v49_v44 = vld [vmem:[%s2987_s1 + $0x108] sm:$0xff]  ;;  %v2567_v46 = vpack.c.bf16 %v33_v40, %v30_v39 }
   0xb   :  { %1917 = vmatprep.subr.bf16.mxu1 %v2413_v3  ;;  %v2555_v42 = vpack.c.bf16 %v50_v38, %v47_v36  ;;  %v53_v45 = vld [vmem:[%s2987_s1 + $0x128] sm:$0xff]  ;;  %v56_v47 = vld [vmem:[%s2987_s1 + $0x140] sm:$0xff]  ;;  %v39_v49 = vld [vmem:[%s2987_s1 + $0xb8] sm:$0xff]  ;;  %v2580_v50 = vpack.c.bf16 %v49_v44, %v46_v43 }
   0xc   :  { %v36_v48 = vld [vmem:[%s2987_s1 + $0xa0] sm:$0xff]  ;;  %v2583_v51 = vpack.c.bf16 %v56_v47, %v53_v45  ;;  %v55_v53 = vld [vmem:[%s2987_s1 + $0x138] sm:$0xff]  ;;  %v62_v56 = vld [vmem:[%s2987_s1 + $0x170] sm:$0xff] }
   0xd   :  { %1893 = vmatpush1.bf16.msra.mxu0 %v2492_v21  ;;  %v52_v52 = vld [vmem:[%s2987_s1 + $0x120] sm:$0xff]  ;;  %v59_v54 = vld [vmem:[%s2987_s1 + $0x158] sm:$0xff]  ;;  %v2595_v55 = vpack.c.bf16 %v39_v49, %v36_v48  ;;  %v42_v57 = vld [vmem:[%s2987_s1 + $0xd0] sm:$0xff] }
   0xe   :  { %1895 = vmatprep.subr.bf16.mxu0 %v2495_v22  ;;  %1919 = vmatpush3.bf16.msra.mxu1 %v2539_v37  ;;  %v45_v58 = vld [vmem:[%s2987_s1 + $0xe8] sm:$0xff]  ;;  %v2608_v59 = vpack.c.bf16 %v55_v53, %v52_v52  ;;  %v2611_v60 = vpack.c.bf16 %v62_v56, %v59_v54  ;;  %v58_v61 = vld [vmem:[%s2987_s1 + $0x150] sm:$0xff]  ;;  %v48_v0 = vld [vmem:[%s2987_s1 + $0x100] sm:$0xff] }
   0xf   :  { %1920 = vmatprep.subr.bf16.mxu1 %v2413_v3  ;;  %v61_v62 = vld [vmem:[%s2987_s1 + $0x168] sm:$0xff]  ;;  %v2620_v63 = vpack.c.bf16 %v45_v58, %v42_v57  ;;  %v51_v1 = vld [vmem:[%s2987_s1 + $0x118] sm:$0xff]  ;;  %v54_v7 = vld [vmem:[%s2987_s1 + $0x130] sm:$0xff] }
  0x10   :  { %v2630_v2 = vpack.c.bf16 %v61_v62, %v58_v61  ;;  %v2634_v6 = vpack.c.bf16 %v51_v1, %v48_v0  ;;  %v57_v8 = vld [vmem:[%s2987_s1 + $0x148] sm:$0xff]  ;;  %v2644_v11 = vld [vmem:[#allocation2] sm:$0x3]  ;;  %v63_v14 = vld [vmem:[%s2987_s1 + $0x178] sm:$0xff] }
  0x11   :  { %1897 = vmatpush1.bf16.msra.mxu0 %v2521_v31  ;;  %v2647_v12 = vpack.c.bf16 %v57_v8, %v54_v7  ;;  %v60_v13 = vld [vmem:[%s2987_s1 + $0x160] sm:$0xff] }
  0x12   :  { %1899 = vmatprep.subr.bf16.mxu0 %v2527_v33  ;;  %1922 = vmatpush3.bf16.msra.mxu1 %v2567_v46  ;;  %v2661_v17 = vpack.c.bf16 %v63_v14, %v60_v13  ;;  %v65_v18 = vld [vmem:[%s2988_s0] sm:$0x3f]  ;;  %v1438_v53 = vld [vmem:[%s2988_s0 + $0x6] sm:$0x3f] }
  0x13   :  { %1923 = vmatprep.subr.bf16.mxu1 %v2413_v3  ;;  %v215_v20 = vrot.slane %v65_v18, 2  ;;  %v225_v38 = vrot.slane %v65_v18, 4  ;;  %v385_v57 = vrot.slane %v1438_v53, 2 }
  0x15   :  { %1901 = vmatpush1.bf16.msra.mxu0 %v2552_v41 }
  0x16   :  { %1903 = vmatprep.subr.bf16.mxu0 %v2555_v42  ;;  %1925 = vmatpush3.bf16.msra.mxu1 %v2595_v55 }
  0x17   :  { %1926 = vmatprep.subr.bf16.mxu1 %v2413_v3 }
  0x19   :  { %1905 = vmatpush1.bf16.msra.mxu0 %v2580_v50 }
  0x1a   :  { %1907 = vmatprep.subr.bf16.mxu0 %v2583_v51  ;;  %1928 = vmatpush3.bf16.msra.mxu1 %v2620_v63 }
  0x1b   :  { %1929 = vmatprep.subr.bf16.mxu1 %v2413_v3 }
  0x1d   :  { %1909 = vmatpush1.bf16.msra.mxu0 %v2608_v59 }
  0x1e   :  { %1911 = vmatprep.subr.bf16.mxu0 %v2611_v60  ;;  %1931 = vmatpush3.bf16.msra.mxu1 %v2634_v6 }
  0x1f   :  { %1932 = vmatprep.subr.bf16.mxu1 %v2413_v3 }
  0x21   :  { %1913 = vmatpush1.bf16.msra.mxu0 %v2630_v2 }
  0x22   :  { %1939 = vmatprep.subr.bf16.mxu0 %v2443_v5  ;;  %1934 = vmatpush3.bf16.msra.mxu1 %v2647_v12 }
  0x23   :  { %1935 = vmatprep.subr.bf16.mxu1 %v2413_v3 }
  0x24   :  { %131 = vmatmul.mubr.f32.vlgmr.msra.gmra.mrb[0].mxu0 %v2644_v11 }
  0x25   :  { %1941 = vmatpush1.bf16.msra.mxu0 %v2456_v9  ;;  %300 = vmatprep.mubr.f32.mxu0 %v2414_v4 }
  0x26   :  { %1943 = vmatprep.subr.bf16.mxu0 %v2458_v10  ;;  %1937 = vmatpush3.bf16.msra.mxu1 %v2661_v17 }
  0x27   :  { %1970 = vmatprep.subr.bf16.mxu1 %v2413_v3 }
  0x29   :  { %1945 = vmatpush1.bf16.msra.mxu0 %v2474_v15  ;;  %1635 = vmatmul.mubr.f32.vlgmr.msra.gmra.mrb[0].mxu1 %v2644_v11 }
  0x2a   :  { %1947 = vmatprep.subr.bf16.mxu0 %v2477_v16  ;;  %1972 = vmatpush3.bf16.msra.mxu1 %v2515_v29 }
  0x2b   :  { %1973 = vmatprep.subr.bf16.mxu1 %v2413_v3  ;;  %1669 = vmatprep.mubr.msk.f32.mxu1 %vm2415_vm0, %v2414_v4 }
  0x2d   :  { %1949 = vmatpush1.bf16.msra.mxu0 %v2492_v21 }
  0x2e   :  { %1951 = vmatprep.subr.bf16.mxu0 %v2495_v22  ;;  %1975 = vmatpush3.bf16.msra.mxu1 %v2539_v37 }
  0x2f   :  { %1976 = vmatprep.subr.bf16.mxu1 %v2413_v3 }
  0x31   :  { %1953 = vmatpush1.bf16.msra.mxu0 %v2521_v31 }
  0x32   :  { %1955 = vmatprep.subr.bf16.mxu0 %v2527_v33  ;;  %1978 = vmatpush3.bf16.msra.mxu1 %v2567_v46 }
  0x33   :  { %1979 = vmatprep.subr.bf16.mxu1 %v2413_v3 }
  0x35   :  { %1957 = vmatpush1.bf16.msra.mxu0 %v2552_v41 }
  0x36   :  { %1959 = vmatprep.subr.bf16.mxu0 %v2555_v42  ;;  %1981 = vmatpush3.bf16.msra.mxu1 %v2595_v55 }
  0x37   :  { %1982 = vmatprep.subr.bf16.mxu1 %v2413_v3 }
  0x39   :  { %1961 = vmatpush1.bf16.msra.mxu0 %v2580_v50 }
  0x3a   :  { %1963 = vmatprep.subr.bf16.mxu0 %v2583_v51  ;;  %1984 = vmatpush3.bf16.msra.mxu1 %v2620_v63 }
  0x3b   :  { %1985 = vmatprep.subr.bf16.mxu1 %v2413_v3 }
  0x3d   :  { %1965 = vmatpush1.bf16.msra.mxu0 %v2608_v59 }
  0x3e   :  { %1967 = vmatprep.subr.bf16.mxu0 %v2611_v60  ;;  %1987 = vmatpush3.bf16.msra.mxu1 %v2634_v6 }
  0x3f   :  { %1988 = vmatprep.subr.bf16.mxu1 %v2413_v3 }
  0x41   :  { %1969 = vmatpush1.bf16.msra.mxu0 %v2630_v2 }
  0x42   :  { %1995 = vmatprep.subr.bf16.mxu0 %v2443_v5  ;;  %1990 = vmatpush3.bf16.msra.mxu1 %v2647_v12 }
  0x43   :  { %1991 = vmatprep.subr.bf16.mxu1 %v2413_v3 }
  0x46   :  { %1993 = vmatpush3.bf16.msra.mxu1 %v2661_v17 }
  0x47   :  { %2026 = vmatprep.subr.bf16.mxu1 %v2413_v3 }
  0xf7   :  { %v132_v19 = vpop.f32.mrb[0].mxu0 }
  0xf8   :  { %v207_v23 = vadd.f32 %v132_v19, %v65_v18  ;;  %v134_v24 = vpop.f32.mrb[1].mxu0  ;;  %v395_v18 = vrot.slane %v1438_v53, 4 }
  0xf9   :  { %v217_v26 = vadd.f32 %v215_v20, %v134_v24 }
  0xfa   :  { %v1436_v25 = vmul.f32 -1.442695, %v207_v23 }
  0xfb   :  { %v1437_v27 = vmul.f32 -1.442695, %v217_v26 }
  0xfc   :  { %2333 = vpow2.f32 %v1436_v25  ;;  %v203_v28 = vpop.f32.mrb[0].mxu1 }
  0xfd   :  { %v1636_v30 = vpop.f32.mrb[1].mxu1  ;;  %2335 = vpow2.f32 %v1437_v27 }
 0x106   :  { %v2334_v32 = vpop.eup %2333 }
 0x107   :  { %v211_v34 = vadd.f32 1.0, %v2334_v32  ;;  %v2336_v35 = vpop.eup %2335  ;;  %v1442_v32 = vld [vmem:[%s2988_s0 + $0xc] sm:$0x3f] }
 0x108   :  { %v221_v36 = vadd.f32 1.0, %v2336_v35 }
 0x109   :  { %2337 = vrcp.f32 %v211_v34 }
 0x10a   :  { %2339 = vrcp.f32 %v221_v36  ;;  %v556_v36 = vrot.slane %v1442_v32, 2 }
 0x113   :  { %v2338_v39 = vpop.eup %2337 }
 0x114   :  { %v224_v40 = vmul.f32 %v2338_v39, %v203_v28  ;;  %v2340_v44 = vpop.eup %2339 }
 0x115   :  { %v230_v45 = vsub.f32 1.0, %v2340_v44  ;;  %v229_v48 = vmul.f32 %v2340_v44, %v2644_v11 }
 0x116   :  { %v227_v43 = vadd.f32 %v225_v38, %v224_v40 }
 0x118   :  { %2341 = vtanh.f32 %v227_v43 }
 0x122   :  { %v2342_v47 = vpop.eup %2341 }
 0x123   :  { %v231_v49 = vmul.f32 %v2342_v47, %v230_v45 }
 0x125   :  { %v2704_v52 = vadd.f32 %v231_v49, %v229_v48 }
 0x127   :  { %233 = vst [vmem:[%s2989_s2] sm:$0x3] %v2704_v52  ;;  %301 = vmatmul.mubr.f32.vlgmr.msra.gmra.mrb[2].mxu0 %v2704_v52  ;;  %1670 = vmatmul.mubr.f32.vlgmr.msra.gmra.mrb[2].mxu1 %v2704_v52 }
 0x128   :  { %1997 = vmatpush1.bf16.msra.mxu0 %v2456_v9  ;;  %2028 = vmatpush3.bf16.msra.mxu1 %v2515_v29 }
 0x129   :  { %1999 = vmatprep.subr.bf16.mxu0 %v2458_v10  ;;  %2029 = vmatprep.subr.bf16.mxu1 %v2413_v3 }
 0x12a   :  { %471 = vmatprep.mubr.f32.mxu0 %v2414_v4  ;;  %1704 = vmatprep.mubr.msk.f32.mxu1 %vm2415_vm0, %v2414_v4 }
 0x12c   :  { %2001 = vmatpush1.bf16.msra.mxu0 %v2474_v15  ;;  %2031 = vmatpush3.bf16.msra.mxu1 %v2539_v37 }
 0x12d   :  { %2003 = vmatprep.subr.bf16.mxu0 %v2477_v16  ;;  %2032 = vmatprep.subr.bf16.mxu1 %v2413_v3 }
 0x130   :  { %2005 = vmatpush1.bf16.msra.mxu0 %v2492_v21  ;;  %2034 = vmatpush3.bf16.msra.mxu1 %v2567_v46 }
 0x131   :  { %2007 = vmatprep.subr.bf16.mxu0 %v2495_v22  ;;  %2035 = vmatprep.subr.bf16.mxu1 %v2413_v3 }
 0x134   :  { %2009 = vmatpush1.bf16.msra.mxu0 %v2521_v31  ;;  %2037 = vmatpush3.bf16.msra.mxu1 %v2595_v55 }
 0x135   :  { %2011 = vmatprep.subr.bf16.mxu0 %v2527_v33  ;;  %2038 = vmatprep.subr.bf16.mxu1 %v2413_v3 }
 0x138   :  { %2013 = vmatpush1.bf16.msra.mxu0 %v2552_v41  ;;  %2040 = vmatpush3.bf16.msra.mxu1 %v2620_v63 }
 0x139   :  { %2015 = vmatprep.subr.bf16.mxu0 %v2555_v42  ;;  %2041 = vmatprep.subr.bf16.mxu1 %v2413_v3 }
 0x13c   :  { %2017 = vmatpush1.bf16.msra.mxu0 %v2580_v50  ;;  %2043 = vmatpush3.bf16.msra.mxu1 %v2634_v6 }
 0x13d   :  { %2019 = vmatprep.subr.bf16.mxu0 %v2583_v51  ;;  %2044 = vmatprep.subr.bf16.mxu1 %v2413_v3 }
 0x140   :  { %2021 = vmatpush1.bf16.msra.mxu0 %v2608_v59  ;;  %2046 = vmatpush3.bf16.msra.mxu1 %v2647_v12 }
 0x141   :  { %2023 = vmatprep.subr.bf16.mxu0 %v2611_v60  ;;  %2047 = vmatprep.subr.bf16.mxu1 %v2413_v3 }
 0x144   :  { %2025 = vmatpush1.bf16.msra.mxu0 %v2630_v2  ;;  %2049 = vmatpush3.bf16.msra.mxu1 %v2661_v17 }
 0x145   :  { %2051 = vmatprep.subr.bf16.mxu0 %v2443_v5  ;;  %2082 = vmatprep.subr.bf16.mxu1 %v2413_v3 }
 0x1fa   :  { %v302_v54 = vpop.f32.mrb[2].mxu0  ;;  %v373_v56 = vpop.f32.mrb[2].mxu1 }
 0x1fb   :  { %v377_v58 = vadd.f32 %v1438_v53, %v302_v54  ;;  %v304_v61 = vpop.f32.mrb[3].mxu0  ;;  %v1671_v62 = vpop.f32.mrb[3].mxu1  ;;  %v566_v53 = vrot.slane %v1442_v32, 4 }
 0x1fc   :  { %v387_v1 = vadd.f32 %v385_v57, %v304_v61 }
 0x1fd   :  { %v1439_v0 = vmul.f32 -1.442695, %v377_v58 }
 0x1fe   :  { %v1440_v7 = vmul.f32 -1.442695, %v387_v1 }
 0x1ff   :  { %2343 = vpow2.f32 %v1439_v0 }
 0x200   :  { %2345 = vpow2.f32 %v1440_v7 }
 0x209   :  { %v2344_v8 = vpop.eup %2343 }
 0x20a   :  { %v381_v11 = vadd.f32 1.0, %v2344_v8  ;;  %v2346_v13 = vpop.eup %2345  ;;  %v1446_v8 = vld [vmem:[%s2988_s0 + $0x12] sm:$0x3f] }
 0x20b   :  { %v391_v14 = vadd.f32 1.0, %v2346_v13 }
 0x20c   :  { %2347 = vrcp.f32 %v381_v11 }
 0x20d   :  { %2349 = vrcp.f32 %v391_v14  ;;  %v727_v14 = vrot.slane %v1446_v8, 2 }
 0x216   :  { %v2348_v19 = vpop.eup %2347 }
 0x217   :  { %v394_v20 = vmul.f32 %v2348_v19, %v373_v56  ;;  %v2350_v24 = vpop.eup %2349 }
 0x218   :  { %v400_v25 = vsub.f32 1.0, %v2350_v24  ;;  %v399_v27 = vmul.f32 %v2350_v24, %v2704_v52 }
 0x219   :  { %v397_v23 = vadd.f32 %v395_v18, %v394_v20 }
 0x21b   :  { %2351 = vtanh.f32 %v397_v23 }
 0x225   :  { %v2352_v26 = vpop.eup %2351 }
 0x226   :  { %v401_v28 = vmul.f32 %v2352_v26, %v400_v25 }
 0x228   :  { %v2751_v30 = vadd.f32 %v401_v28, %v399_v27 }
 0x22a   :  { %1441 = vst [vmem:[%s2989_s2 + $0x2] sm:$0x3] %v2751_v30  ;;  %472 = vmatmul.mubr.f32.vlgmr.msra.gmra.mrb[4].mxu0 %v2751_v30  ;;  %1705 = vmatmul.mubr.f32.vlgmr.msra.gmra.mrb[4].mxu1 %v2751_v30 }
 0x22b   :  { %2053 = vmatpush1.bf16.msra.mxu0 %v2456_v9  ;;  %2084 = vmatpush3.bf16.msra.mxu1 %v2515_v29 }
 0x22c   :  { %2055 = vmatprep.subr.bf16.mxu0 %v2458_v10  ;;  %2085 = vmatprep.subr.bf16.mxu1 %v2413_v3 }
 0x22d   :  { %642 = vmatprep.mubr.f32.mxu0 %v2414_v4  ;;  %1739 = vmatprep.mubr.msk.f32.mxu1 %vm2415_vm0, %v2414_v4 }
 0x22f   :  { %2057 = vmatpush1.bf16.msra.mxu0 %v2474_v15  ;;  %2087 = vmatpush3.bf16.msra.mxu1 %v2539_v37 }
 0x230   :  { %2059 = vmatprep.subr.bf16.mxu0 %v2477_v16  ;;  %2088 = vmatprep.subr.bf16.mxu1 %v2413_v3 }
 0x233   :  { %2061 = vmatpush1.bf16.msra.mxu0 %v2492_v21  ;;  %2090 = vmatpush3.bf16.msra.mxu1 %v2567_v46 }
 0x234   :  { %2063 = vmatprep.subr.bf16.mxu0 %v2495_v22  ;;  %2091 = vmatprep.subr.bf16.mxu1 %v2413_v3 }
 0x237   :  { %2065 = vmatpush1.bf16.msra.mxu0 %v2521_v31  ;;  %2093 = vmatpush3.bf16.msra.mxu1 %v2595_v55 }
 0x238   :  { %2067 = vmatprep.subr.bf16.mxu0 %v2527_v33  ;;  %2094 = vmatprep.subr.bf16.mxu1 %v2413_v3 }
 0x23b   :  { %2069 = vmatpush1.bf16.msra.mxu0 %v2552_v41  ;;  %2096 = vmatpush3.bf16.msra.mxu1 %v2620_v63 }
 0x23c   :  { %2071 = vmatprep.subr.bf16.mxu0 %v2555_v42  ;;  %2097 = vmatprep.subr.bf16.mxu1 %v2413_v3 }
 0x23f   :  { %2073 = vmatpush1.bf16.msra.mxu0 %v2580_v50  ;;  %2099 = vmatpush3.bf16.msra.mxu1 %v2634_v6 }
 0x240   :  { %2075 = vmatprep.subr.bf16.mxu0 %v2583_v51  ;;  %2100 = vmatprep.subr.bf16.mxu1 %v2413_v3 }
 0x243   :  { %2077 = vmatpush1.bf16.msra.mxu0 %v2608_v59  ;;  %2102 = vmatpush3.bf16.msra.mxu1 %v2647_v12 }
 0x244   :  { %2079 = vmatprep.subr.bf16.mxu0 %v2611_v60  ;;  %2103 = vmatprep.subr.bf16.mxu1 %v2413_v3 }
 0x247   :  { %2081 = vmatpush1.bf16.msra.mxu0 %v2630_v2  ;;  %2105 = vmatpush3.bf16.msra.mxu1 %v2661_v17 }
 0x248   :  { %2107 = vmatprep.subr.bf16.mxu0 %v2443_v5  ;;  %2138 = vmatprep.subr.bf16.mxu1 %v2413_v3 }
 0x2fd   :  { %v473_v34 = vpop.f32.mrb[4].mxu0  ;;  %v544_v35 = vpop.f32.mrb[4].mxu1 }
 0x2fe   :  { %v548_v38 = vadd.f32 %v1442_v32, %v473_v34  ;;  %v475_v39 = vpop.f32.mrb[5].mxu0  ;;  %v1706_v40 = vpop.f32.mrb[5].mxu1  ;;  %v737_v32 = vrot.slane %v1446_v8, 4 }
 0x2ff   :  { %v558_v44 = vadd.f32 %v556_v36, %v475_v39 }
 0x300   :  { %v1443_v43 = vmul.f32 -1.442695, %v548_v38 }
 0x301   :  { %v1444_v45 = vmul.f32 -1.442695, %v558_v44 }
 0x302   :  { %2353 = vpow2.f32 %v1443_v43 }
 0x303   :  { %2355 = vpow2.f32 %v1444_v45 }
 0x30c   :  { %v2354_v47 = vpop.eup %2353 }
 0x30d   :  { %v552_v48 = vadd.f32 1.0, %v2354_v47  ;;  %v2356_v49 = vpop.eup %2355  ;;  %v1450_v47 = vld [vmem:[%s2988_s0 + $0x18] sm:$0x3f] }
 0x30e   :  { %v562_v52 = vadd.f32 1.0, %v2356_v49 }
 0x30f   :  { %2357 = vrcp.f32 %v552_v48 }
 0x310   :  { %2359 = vrcp.f32 %v562_v52  ;;  %v898_v52 = vrot.slane %v1450_v47, 2 }
 0x319   :  { %v2358_v54 = vpop.eup %2357 }
 0x31a   :  { %v565_v56 = vmul.f32 %v2358_v54, %v544_v35  ;;  %v2360_v58 = vpop.eup %2359 }
 0x31b   :  { %v571_v61 = vsub.f32 1.0, %v2360_v58  ;;  %v570_v0 = vmul.f32 %v2360_v58, %v2751_v30 }
 0x31c   :  { %v568_v57 = vadd.f32 %v566_v53, %v565_v56 }
 0x31e   :  { %2361 = vtanh.f32 %v568_v57 }
 0x328   :  { %v2362_v62 = vpop.eup %2361 }
 0x329   :  { %v572_v1 = vmul.f32 %v2362_v62, %v571_v61 }
 0x32b   :  { %v2798_v7 = vadd.f32 %v572_v1, %v570_v0 }
 0x32d   :  { %1445 = vst [vmem:[%s2989_s2 + $0x4] sm:$0x3] %v2798_v7  ;;  %643 = vmatmul.mubr.f32.vlgmr.msra.gmra.mrb[6].mxu0 %v2798_v7  ;;  %1740 = vmatmul.mubr.f32.vlgmr.msra.gmra.mrb[6].mxu1 %v2798_v7 }
 0x32e   :  { %2109 = vmatpush1.bf16.msra.mxu0 %v2456_v9  ;;  %2140 = vmatpush3.bf16.msra.mxu1 %v2515_v29 }
 0x32f   :  { %2111 = vmatprep.subr.bf16.mxu0 %v2458_v10  ;;  %2141 = vmatprep.subr.bf16.mxu1 %v2413_v3 }
 0x330   :  { %813 = vmatprep.mubr.f32.mxu0 %v2414_v4  ;;  %1774 = vmatprep.mubr.msk.f32.mxu1 %vm2415_vm0, %v2414_v4 }
 0x332   :  { %2113 = vmatpush1.bf16.msra.mxu0 %v2474_v15  ;;  %2143 = vmatpush3.bf16.msra.mxu1 %v2539_v37 }
 0x333   :  { %2115 = vmatprep.subr.bf16.mxu0 %v2477_v16  ;;  %2144 = vmatprep.subr.bf16.mxu1 %v2413_v3 }
 0x336   :  { %2117 = vmatpush1.bf16.msra.mxu0 %v2492_v21  ;;  %2146 = vmatpush3.bf16.msra.mxu1 %v2567_v46 }
 0x337   :  { %2119 = vmatprep.subr.bf16.mxu0 %v2495_v22  ;;  %2147 = vmatprep.subr.bf16.mxu1 %v2413_v3 }
 0x33a   :  { %2121 = vmatpush1.bf16.msra.mxu0 %v2521_v31  ;;  %2149 = vmatpush3.bf16.msra.mxu1 %v2595_v55 }
 0x33b   :  { %2123 = vmatprep.subr.bf16.mxu0 %v2527_v33  ;;  %2150 = vmatprep.subr.bf16.mxu1 %v2413_v3 }
 0x33e   :  { %2125 = vmatpush1.bf16.msra.mxu0 %v2552_v41  ;;  %2152 = vmatpush3.bf16.msra.mxu1 %v2620_v63 }
 0x33f   :  { %2127 = vmatprep.subr.bf16.mxu0 %v2555_v42  ;;  %2153 = vmatprep.subr.bf16.mxu1 %v2413_v3 }
 0x342   :  { %2129 = vmatpush1.bf16.msra.mxu0 %v2580_v50  ;;  %2155 = vmatpush3.bf16.msra.mxu1 %v2634_v6 }
 0x343   :  { %2131 = vmatprep.subr.bf16.mxu0 %v2583_v51  ;;  %2156 = vmatprep.subr.bf16.mxu1 %v2413_v3 }
 0x346   :  { %2133 = vmatpush1.bf16.msra.mxu0 %v2608_v59  ;;  %2158 = vmatpush3.bf16.msra.mxu1 %v2647_v12 }
 0x347   :  { %2135 = vmatprep.subr.bf16.mxu0 %v2611_v60  ;;  %2159 = vmatprep.subr.bf16.mxu1 %v2413_v3 }
 0x34a   :  { %2137 = vmatpush1.bf16.msra.mxu0 %v2630_v2  ;;  %2161 = vmatpush3.bf16.msra.mxu1 %v2661_v17 }
 0x34b   :  { %2163 = vmatprep.subr.bf16.mxu0 %v2443_v5  ;;  %2194 = vmatprep.subr.bf16.mxu1 %v2413_v3 }
 0x400   :  { %v644_v11 = vpop.f32.mrb[6].mxu0  ;;  %v715_v13 = vpop.f32.mrb[6].mxu1 }
 0x401   :  { %v719_v18 = vadd.f32 %v1446_v8, %v644_v11  ;;  %v646_v19 = vpop.f32.mrb[7].mxu0  ;;  %v1741_v20 = vpop.f32.mrb[7].mxu1  ;;  %v908_v8 = vrot.slane %v1450_v47, 4 }
 0x402   :  { %v729_v24 = vadd.f32 %v727_v14, %v646_v19 }
 0x403   :  { %v1447_v23 = vmul.f32 -1.442695, %v719_v18 }
 0x404   :  { %v1448_v25 = vmul.f32 -1.442695, %v729_v24 }
 0x405   :  { %2363 = vpow2.f32 %v1447_v23 }
 0x406   :  { %2365 = vpow2.f32 %v1448_v25 }
 0x40f   :  { %v2364_v26 = vpop.eup %2363 }
 0x410   :  { %v723_v27 = vadd.f32 1.0, %v2364_v26  ;;  %v2366_v28 = vpop.eup %2365  ;;  %v1454_v26 = vld [vmem:[%s2988_s0 + $0x1e] sm:$0x3f] }
 0x411   :  { %v733_v30 = vadd.f32 1.0, %v2366_v28 }
 0x412   :  { %2367 = vrcp.f32 %v723_v27 }
 0x413   :  { %2369 = vrcp.f32 %v733_v30  ;;  %v1069_v30 = vrot.slane %v1454_v26, 2 }
 0x41c   :  { %v2368_v34 = vpop.eup %2367 }
 0x41d   :  { %v736_v35 = vmul.f32 %v2368_v34, %v715_v13  ;;  %v2370_v38 = vpop.eup %2369 }
 0x41e   :  { %v742_v39 = vsub.f32 1.0, %v2370_v38  ;;  %v741_v43 = vmul.f32 %v2370_v38, %v2798_v7 }
 0x41f   :  { %v739_v36 = vadd.f32 %v737_v32, %v736_v35 }
 0x421   :  { %2371 = vtanh.f32 %v739_v36 }
 0x42b   :  { %v2372_v40 = vpop.eup %2371 }
 0x42c   :  { %v743_v44 = vmul.f32 %v2372_v40, %v742_v39 }
 0x42e   :  { %v2845_v45 = vadd.f32 %v743_v44, %v741_v43 }
 0x430   :  { %1449 = vst [vmem:[%s2989_s2 + $0x6] sm:$0x3] %v2845_v45  ;;  %814 = vmatmul.mubr.f32.vlgmr.msra.gmra.mrb[8].mxu0 %v2845_v45  ;;  %1775 = vmatmul.mubr.f32.vlgmr.msra.gmra.mrb[8].mxu1 %v2845_v45 }
 0x431   :  { %2165 = vmatpush1.bf16.msra.mxu0 %v2456_v9  ;;  %2196 = vmatpush3.bf16.msra.mxu1 %v2515_v29 }
 0x432   :  { %2167 = vmatprep.subr.bf16.mxu0 %v2458_v10  ;;  %2197 = vmatprep.subr.bf16.mxu1 %v2413_v3 }
 0x433   :  { %984 = vmatprep.mubr.f32.mxu0 %v2414_v4  ;;  %1809 = vmatprep.mubr.msk.f32.mxu1 %vm2415_vm0, %v2414_v4 }
 0x435   :  { %2169 = vmatpush1.bf16.msra.mxu0 %v2474_v15  ;;  %2199 = vmatpush3.bf16.msra.mxu1 %v2539_v37 }
 0x436   :  { %2171 = vmatprep.subr.bf16.mxu0 %v2477_v16  ;;  %2200 = vmatprep.subr.bf16.mxu1 %v2413_v3 }
 0x439   :  { %2173 = vmatpush1.bf16.msra.mxu0 %v2492_v21  ;;  %2202 = vmatpush3.bf16.msra.mxu1 %v2567_v46 }
 0x43a   :  { %2175 = vmatprep.subr.bf16.mxu0 %v2495_v22  ;;  %2203 = vmatprep.subr.bf16.mxu1 %v2413_v3 }
 0x43d   :  { %2177 = vmatpush1.bf16.msra.mxu0 %v2521_v31  ;;  %2205 = vmatpush3.bf16.msra.mxu1 %v2595_v55 }
 0x43e   :  { %2179 = vmatprep.subr.bf16.mxu0 %v2527_v33  ;;  %2206 = vmatprep.subr.bf16.mxu1 %v2413_v3 }
 0x441   :  { %2181 = vmatpush1.bf16.msra.mxu0 %v2552_v41  ;;  %2208 = vmatpush3.bf16.msra.mxu1 %v2620_v63 }
 0x442   :  { %2183 = vmatprep.subr.bf16.mxu0 %v2555_v42  ;;  %2209 = vmatprep.subr.bf16.mxu1 %v2413_v3 }
 0x445   :  { %2185 = vmatpush1.bf16.msra.mxu0 %v2580_v50  ;;  %2211 = vmatpush3.bf16.msra.mxu1 %v2634_v6 }
 0x446   :  { %2187 = vmatprep.subr.bf16.mxu0 %v2583_v51  ;;  %2212 = vmatprep.subr.bf16.mxu1 %v2413_v3 }
 0x449   :  { %2189 = vmatpush1.bf16.msra.mxu0 %v2608_v59  ;;  %2214 = vmatpush3.bf16.msra.mxu1 %v2647_v12 }
 0x44a   :  { %2191 = vmatprep.subr.bf16.mxu0 %v2611_v60  ;;  %2215 = vmatprep.subr.bf16.mxu1 %v2413_v3 }
 0x44d   :  { %2193 = vmatpush1.bf16.msra.mxu0 %v2630_v2  ;;  %2217 = vmatpush3.bf16.msra.mxu1 %v2661_v17 }
 0x44e   :  { %2219 = vmatprep.subr.bf16.mxu0 %v2443_v5  ;;  %2250 = vmatprep.subr.bf16.mxu1 %v2413_v3 }
 0x503   :  { %v815_v48 = vpop.f32.mrb[8].mxu0  ;;  %v886_v49 = vpop.f32.mrb[8].mxu1 }
 0x504   :  { %v890_v53 = vadd.f32 %v1450_v47, %v815_v48  ;;  %v817_v54 = vpop.f32.mrb[9].mxu0  ;;  %v1776_v56 = vpop.f32.mrb[9].mxu1 }
 0x505   :  { %v900_v58 = vadd.f32 %v898_v52, %v817_v54 }
 0x506   :  { %v1451_v57 = vmul.f32 -1.442695, %v890_v53 }
 0x507   :  { %v1452_v61 = vmul.f32 -1.442695, %v900_v58 }
 0x508   :  { %2373 = vpow2.f32 %v1451_v57 }
 0x509   :  { %2375 = vpow2.f32 %v1452_v61 }
 0x512   :  { %v2374_v62 = vpop.eup %2373 }
 0x513   :  { %v894_v0 = vadd.f32 1.0, %v2374_v62  ;;  %v2376_v1 = vpop.eup %2375 }
 0x514   :  { %v904_v7 = vadd.f32 1.0, %v2376_v1 }
 0x515   :  { %2377 = vrcp.f32 %v894_v0 }
 0x516   :  { %2379 = vrcp.f32 %v904_v7 }
 0x51f   :  { %v2378_v11 = vpop.eup %2377 }
 0x520   :  { %v907_v13 = vmul.f32 %v2378_v11, %v886_v49  ;;  %v2380_v18 = vpop.eup %2379 }
 0x521   :  { %v913_v19 = vsub.f32 1.0, %v2380_v18  ;;  %v912_v23 = vmul.f32 %v2380_v18, %v2845_v45  ;;  %v1079_v45 = vrot.slane %v1454_v26, 4 }
 0x522   :  { %v910_v14 = vadd.f32 %v908_v8, %v907_v13 }
 0x524   :  { %2381 = vtanh.f32 %v910_v14 }
 0x52e   :  { %v2382_v20 = vpop.eup %2381 }
 0x52f   :  { %v914_v24 = vmul.f32 %v2382_v20, %v913_v19 }
 0x531   :  { %v2892_v25 = vadd.f32 %v914_v24, %v912_v23 }
 0x533   :  { %1453 = vst [vmem:[%s2989_s2 + $0x8] sm:$0x3] %v2892_v25  ;;  %985 = vmatmul.mubr.f32.vlgmr.msra.gmra.mrb[10].mxu0 %v2892_v25  ;;  %1810 = vmatmul.mubr.f32.vlgmr.msra.gmra.mrb[10].mxu1 %v2892_v25 }
 0x534   :  { %2221 = vmatpush1.bf16.msra.mxu0 %v2456_v9  ;;  %2252 = vmatpush3.bf16.msra.mxu1 %v2515_v29 }
 0x535   :  { %2223 = vmatprep.subr.bf16.mxu0 %v2458_v10  ;;  %2253 = vmatprep.subr.bf16.mxu1 %v2413_v3 }
 0x536   :  { %1155 = vmatprep.mubr.f32.mxu0 %v2414_v4  ;;  %1844 = vmatprep.mubr.msk.f32.mxu1 %vm2415_vm0, %v2414_v4 }
 0x538   :  { %2225 = vmatpush1.bf16.msra.mxu0 %v2474_v15  ;;  %2255 = vmatpush3.bf16.msra.mxu1 %v2539_v37 }
 0x539   :  { %2227 = vmatprep.subr.bf16.mxu0 %v2477_v16  ;;  %2256 = vmatprep.subr.bf16.mxu1 %v2413_v3 }
 0x53c   :  { %2229 = vmatpush1.bf16.msra.mxu0 %v2492_v21  ;;  %2258 = vmatpush3.bf16.msra.mxu1 %v2567_v46 }
 0x53d   :  { %2231 = vmatprep.subr.bf16.mxu0 %v2495_v22  ;;  %2259 = vmatprep.subr.bf16.mxu1 %v2413_v3 }
 0x540   :  { %2233 = vmatpush1.bf16.msra.mxu0 %v2521_v31  ;;  %2261 = vmatpush3.bf16.msra.mxu1 %v2595_v55 }
 0x541   :  { %2235 = vmatprep.subr.bf16.mxu0 %v2527_v33  ;;  %2262 = vmatprep.subr.bf16.mxu1 %v2413_v3 }
 0x544   :  { %2237 = vmatpush1.bf16.msra.mxu0 %v2552_v41  ;;  %2264 = vmatpush3.bf16.msra.mxu1 %v2620_v63 }
 0x545   :  { %2239 = vmatprep.subr.bf16.mxu0 %v2555_v42  ;;  %2265 = vmatprep.subr.bf16.mxu1 %v2413_v3 }
 0x548   :  { %2241 = vmatpush1.bf16.msra.mxu0 %v2580_v50  ;;  %2267 = vmatpush3.bf16.msra.mxu1 %v2634_v6 }
 0x549   :  { %2243 = vmatprep.subr.bf16.mxu0 %v2583_v51  ;;  %2268 = vmatprep.subr.bf16.mxu1 %v2413_v3 }
 0x54c   :  { %2245 = vmatpush1.bf16.msra.mxu0 %v2608_v59  ;;  %2270 = vmatpush3.bf16.msra.mxu1 %v2647_v12 }
 0x54d   :  { %2247 = vmatprep.subr.bf16.mxu0 %v2611_v60  ;;  %2271 = vmatprep.subr.bf16.mxu1 %v2413_v3 }
 0x550   :  { %2249 = vmatpush1.bf16.msra.mxu0 %v2630_v2  ;;  %2273 = vmatpush3.bf16.msra.mxu1 %v2661_v17 }
 0x551   :  { %2275 = vmatprep.subr.bf16.mxu0 %v2443_v5  ;;  %2306 = vmatprep.subr.bf16.mxu1 %v2413_v3 }
 0x606   :  { %v986_v27 = vpop.f32.mrb[10].mxu0  ;;  %v1057_v28 = vpop.f32.mrb[10].mxu1 }
 0x607   :  { %v1061_v32 = vadd.f32 %v1454_v26, %v986_v27  ;;  %v988_v34 = vpop.f32.mrb[11].mxu0  ;;  %v1811_v35 = vpop.f32.mrb[11].mxu1 }
 0x608   :  { %v1071_v38 = vadd.f32 %v1069_v30, %v988_v34 }
 0x609   :  { %v1455_v36 = vmul.f32 -1.442695, %v1061_v32 }
 0x60a   :  { %v1456_v39 = vmul.f32 -1.442695, %v1071_v38 }
 0x60b   :  { %2383 = vpow2.f32 %v1455_v36 }
 0x60c   :  { %2385 = vpow2.f32 %v1456_v39 }
 0x615   :  { %v2384_v40 = vpop.eup %2383 }
 0x616   :  { %v1065_v43 = vadd.f32 1.0, %v2384_v40  ;;  %v2386_v5 = vpop.eup %2385 }
 0x617   :  { %v1075_v44 = vadd.f32 1.0, %v2386_v5 }
 0x618   :  { %2387 = vrcp.f32 %v1065_v43 }
 0x619   :  { %2389 = vrcp.f32 %v1075_v44 }
 0x622   :  { %v2388_v47 = vpop.eup %2387 }
 0x623   :  { %v1078_v48 = vmul.f32 %v2388_v47, %v1057_v28  ;;  %v2390_v52 = vpop.eup %2389 }
 0x624   :  { %v1084_v53 = vsub.f32 1.0, %v2390_v52  ;;  %v1083_v56 = vmul.f32 %v2390_v52, %v2892_v25 }
 0x625   :  { %v1081_v49 = vadd.f32 %v1079_v45, %v1078_v48 }
 0x627   :  { %2391 = vtanh.f32 %v1081_v49 }
 0x631   :  { %v2392_v54 = vpop.eup %2391 }
 0x632   :  { %v1085_v57 = vmul.f32 %v2392_v54, %v1084_v53 }
 0x634   :  { %v1086_v58 = vadd.f32 %v1085_v57, %v1083_v56 }
 0x636   :  { %1457 = vst [vmem:[%s2989_s2 + $0xa] sm:$0x3] %v1086_v58  ;;  %1156 = vmatmul.mubr.f32.vlgmr.msra.gmra.mrb[12].mxu0 %v1086_v58  ;;  %1845 = vmatmul.mubr.f32.vlgmr.msra.gmra.mrb[12].mxu1 %v1086_v58 }
 0x637   :  { %2277 = vmatpush1.bf16.msra.mxu0 %v2456_v9  ;;  %2308 = vmatpush3.bf16.msra.mxu1 %v2515_v29 }
 0x638   :  { %2279 = vmatprep.subr.bf16.mxu0 %v2458_v10  ;;  %2309 = vmatprep.subr.bf16.mxu1 %v2413_v3 }
 0x639   :  { %1326 = vmatprep.mubr.f32.mxu0 %v2414_v4  ;;  %1879 = vmatprep.mubr.msk.f32.mxu1 %vm2415_vm0, %v2414_v4  ;;  %v1458_v4 = vld [vmem:[%s2988_s0 + $0x24] sm:$0x3f] }
 0x63b   :  { %2281 = vmatpush1.bf16.msra.mxu0 %v2474_v15  ;;  %2311 = vmatpush3.bf16.msra.mxu1 %v2539_v37  ;;  %v1240_v15 = vrot.slane %v1458_v4, 2 }
 0x63c   :  { %2283 = vmatprep.subr.bf16.mxu0 %v2477_v16  ;;  %2312 = vmatprep.subr.bf16.mxu1 %v2413_v3 }
 0x63f   :  { %2285 = vmatpush1.bf16.msra.mxu0 %v2492_v21  ;;  %2314 = vmatpush3.bf16.msra.mxu1 %v2567_v46  ;;  %v1250_v46 = vrot.slane %v1458_v4, 4 }
 0x640   :  { %2287 = vmatprep.subr.bf16.mxu0 %v2495_v22  ;;  %2315 = vmatprep.subr.bf16.mxu1 %v2413_v3 }
 0x643   :  { %2289 = vmatpush1.bf16.msra.mxu0 %v2521_v31  ;;  %2317 = vmatpush3.bf16.msra.mxu1 %v2595_v55 }
 0x644   :  { %2291 = vmatprep.subr.bf16.mxu0 %v2527_v33  ;;  %2318 = vmatprep.subr.bf16.mxu1 %v2413_v3 }
 0x647   :  { %2293 = vmatpush1.bf16.msra.mxu0 %v2552_v41  ;;  %2320 = vmatpush3.bf16.msra.mxu1 %v2620_v63 }
 0x648   :  { %2295 = vmatprep.subr.bf16.mxu0 %v2555_v42  ;;  %2321 = vmatprep.subr.bf16.mxu1 %v2413_v3 }
 0x64b   :  { %2297 = vmatpush1.bf16.msra.mxu0 %v2580_v50  ;;  %2323 = vmatpush3.bf16.msra.mxu1 %v2634_v6 }
 0x64c   :  { %2299 = vmatprep.subr.bf16.mxu0 %v2583_v51  ;;  %2324 = vmatprep.subr.bf16.mxu1 %v2413_v3 }
 0x64f   :  { %2301 = vmatpush1.bf16.msra.mxu0 %v2608_v59  ;;  %2326 = vmatpush3.bf16.msra.mxu1 %v2647_v12 }
 0x650   :  { %2303 = vmatprep.subr.bf16.mxu0 %v2611_v60  ;;  %2327 = vmatprep.subr.bf16.mxu1 %v2413_v3 }
 0x653   :  { %2305 = vmatpush1.bf16.msra.mxu0 %v2630_v2  ;;  %2329 = vmatpush3.bf16.msra.mxu1 %v2661_v17  ;;  %v1462_v17 = vld [vmem:[%s2988_s0 + $0x2a] sm:$0x3f] }
 0x654   :  { %v1411_v0 = vrot.slane %v1462_v17, 2  ;;  %v1421_v24 = vrot.slane %v1462_v17, 4 }
 0x709   :  { %v1157_v9 = vpop.f32.mrb[12].mxu0  ;;  %v1228_v10 = vpop.f32.mrb[12].mxu1 }
 0x70a   :  { %v1232_v16 = vadd.f32 %v1458_v4, %v1157_v9  ;;  %v1159_v21 = vpop.f32.mrb[13].mxu0  ;;  %v1846_v22 = vpop.f32.mrb[13].mxu1 }
 0x70b   :  { %v1242_v31 = vadd.f32 %v1240_v15, %v1159_v21 }
 0x70c   :  { %v1459_v29 = vmul.f32 -1.442695, %v1232_v16 }
 0x70d   :  { %v1460_v33 = vmul.f32 -1.442695, %v1242_v31 }
 0x70e   :  { %2393 = vpow2.f32 %v1459_v29 }
 0x70f   :  { %2395 = vpow2.f32 %v1460_v33 }
 0x718   :  { %v2394_v3 = vpop.eup %2393 }
 0x719   :  { %v1236_v37 = vadd.f32 1.0, %v2394_v3  ;;  %v2396_v41 = vpop.eup %2395 }
 0x71a   :  { %v1246_v42 = vadd.f32 1.0, %v2396_v41 }
 0x71b   :  { %2397 = vrcp.f32 %v1236_v37 }
 0x71c   :  { %2399 = vrcp.f32 %v1246_v42 }
 0x725   :  { %v2398_v50 = vpop.eup %2397 }
 0x726   :  { %v1249_v51 = vmul.f32 %v2398_v50, %v1228_v10  ;;  %v2400_v59 = vpop.eup %2399 }
 0x727   :  { %v1255_v60 = vsub.f32 1.0, %v2400_v59  ;;  %v1254_v2 = vmul.f32 %v2400_v59, %v1086_v58 }
 0x728   :  { %v1252_v55 = vadd.f32 %v1250_v46, %v1249_v51 }
 0x72a   :  { %2401 = vtanh.f32 %v1252_v55 }
 0x734   :  { %v2402_v63 = vpop.eup %2401 }
 0x735   :  { %v1256_v6 = vmul.f32 %v2402_v63, %v1255_v60 }
 0x737   :  { %v1257_v12 = vadd.f32 %v1256_v6, %v1254_v2 }
 0x739   :  { %1461 = vst [vmem:[%s2989_s2 + $0xc] sm:$0x3] %v1257_v12  ;;  %1327 = vmatmul.mubr.f32.vlgmr.msra.gmra.mrb[14].mxu0 %v1257_v12  ;;  %1880 = vmatmul.mubr.f32.vlgmr.msra.gmra.mrb[14].mxu1 %v1257_v12 }
 0x80c   :  { %v1328_v61 = vpop.f32.mrb[14].mxu0  ;;  %v1399_v62 = vpop.f32.mrb[14].mxu1 }
 0x80d   :  { %v1403_v1 = vadd.f32 %v1462_v17, %v1328_v61  ;;  %v1330_v7 = vpop.f32.mrb[15].mxu0  ;;  %v1881_v8 = vpop.f32.mrb[15].mxu1 }
 0x80e   :  { %v1413_v13 = vadd.f32 %v1411_v0, %v1330_v7 }
 0x80f   :  { %v1463_v11 = vmul.f32 -1.442695, %v1403_v1 }
 0x810   :  { %v1464_v14 = vmul.f32 -1.442695, %v1413_v13 }
 0x811   :  { %2403 = vpow2.f32 %v1463_v11 }
 0x812   :  { %2405 = vpow2.f32 %v1464_v14 }
 0x81b   :  { %v2404_v18 = vpop.eup %2403 }
 0x81c   :  { %v1407_v19 = vadd.f32 1.0, %v2404_v18  ;;  %v2406_v20 = vpop.eup %2405 }
 0x81d   :  { %v1417_v23 = vadd.f32 1.0, %v2406_v20 }
 0x81e   :  { %2407 = vrcp.f32 %v1407_v19 }
 0x81f   :  { %2409 = vrcp.f32 %v1417_v23 }
 0x828   :  { %v2408_v25 = vpop.eup %2407 }
 0x829   :  { %v1420_v26 = vmul.f32 %v2408_v25, %v1399_v62  ;;  %v2410_v28 = vpop.eup %2409 }
 0x82a   :  { %v1426_v30 = vsub.f32 1.0, %v2410_v28  ;;  %v1425_v34 = vmul.f32 %v2410_v28, %v1257_v12 }
 0x82b   :  { %v1423_v27 = vadd.f32 %v1421_v24, %v1420_v26 }
 0x82d   :  { %2411 = vtanh.f32 %v1423_v27 }
 0x837   :  { %v2412_v32 = vpop.eup %2411 }
 0x838   :  { %v1427_v35 = vmul.f32 %v2412_v32, %v1426_v30 }
 0x83a   :  { %v1428_v36 = vadd.f32 %v1427_v35, %v1425_v34 }
 0x83c   :  { %1465 = vst [vmem:[%s2989_s2 + $0xe] sm:$0x3] %v1428_v36  ;;  %1431 = vst [vmem:[#allocation2] sm:$0x3] %v1428_v36 }

// kernel: deep_conv_gru_forward.3
= control target key start
LH: loop header
LB: loop body
LE: loop exit
PB: predicated region body
PF: predicated region fallthrough
CT: control target
= control target key end

     0   :  { %12 = vsyncpa [#allocation3], 0  ;;  %s3782_s24 = smov [#allocation2]   ;;  %s4629_s0 = inlined_call_operand.vmem [shape: f32[20,8,64], index: 0, kind: input, shape index: {}]   ;;  %s4630_s1 = inlined_call_operand.vmem [shape: f32[5,64,64], index: 1, kind: input, shape index: {}]   ;;  %s4631_s2 = inlined_call_operand.vmem [shape: f32[1,64], index: 2, kind: input, shape index: {}]   ;;  %s4632_s3 = inlined_call_operand.vmem [shape: f32[5,64,64], index: 3, kind: input, shape index: {}]   ;;  %s4633_s4 = inlined_call_operand.vmem [shape: f32[1,64], index: 4, kind: input, shape index: {}]   ;;  %s4634_s5 = inlined_call_operand.hbm [shape: f32[5,64,64], index: 5, kind: input, shape index: {}]   ;;  %s4635_s6 = inlined_call_operand.vmem [shape: f32[1,64], index: 6, kind: input, shape index: {}]   ;;  %s4636_s7 = inlined_call_operand.vmem [shape: f32[8,8,64], index: 7, kind: output, shape index: {}]  }
   0x1   :  { %s28_s25 = sshll.u32 %s3782_s24, 4  ;;  %s3758_s28 = scalar_lea.hbm %s4634_s5, 5120  ;;  %s29_s25 = int_to_ptr.vmem [resolvable:$true] %s28_s25 }
   0x2   :  { %p3759_p0 = scmp.ne.s32.totalorder %s4634_s5, %s3758_s28  ;;  %p3762_p1 = scmp.lt.u32.totalorder %s3758_s28, %s4634_s5 }
   0x4   :  { %p3764_p2 = pnand %p3762_p1, %p3759_p0 }
   0x6   :  { %3767 = shalt.err (!%p3764_p2)
}
   0x7   :  { %s3768_s10 = scalar_lea.vmem %s29_s25, 5120  ;;  %p3773_p4 = scmp.lt.s32.totalorder %s29_s25, %s29_s25 }
   0x8   :  { %p3769_p3 = scmp.ne.s32.totalorder %s29_s25, %s3768_s10  ;;  %p3774_p5 = scmp.lt.s32.totalorder %s3768_s10, %s3768_s10 }
   0xa   :  { %p3775_p6 = por %p3774_p5, %p3773_p4 }
   0xc   :  { %p3776_p7 = pnand %p3775_p6, %p3769_p3 }
   0xe   :  { %3779 = shalt.err (!%p3776_p7)
}
   0xf   :  { %s3783_s11 = smov 128   ;;  %s3784_s12 = smov 8  }
  0x10   :  { %34 = dma.hbm_to_vmem [thread:$0]  %s4634_s5, 5120, %s29_s25, [#allocation3], %s3783_s11, %s3783_s11, %s3784_s12  }
  0x11   :  { %3780 = dma.done.wait [#allocation3], 5120  }
  0x12   :  { %3781 = vsyncadd [#allocation3], 4294962176  ;;  %v68_v0 = vld [vmem:[%s4630_s1 + $0x40] sm:$0xff]  ;;  %v69_v1 = vld [vmem:[%s4630_s1 + $0x48] sm:$0xff]  ;;  %vm101_vm0 = vcmask 523264  }
  0x13   :  { %v70_v2 = vld [vmem:[%s4630_s1 + $0x50] sm:$0xff]  ;;  %v3371_v3 = vpack.c.bf16 %v69_v1, %v68_v0  ;;  %v71_v4 = vld [vmem:[%s4630_s1 + $0x58] sm:$0xff]  ;;  %v72_v6 = vld [vmem:[%s4630_s1 + $0x60] sm:$0xff] }
  0x14   :  { %v3375_v5 = vpack.c.bf16 %v71_v4, %v70_v2  ;;  %v73_v7 = vld [vmem:[%s4630_s1 + $0x68] sm:$0xff]  ;;  %v74_v10 = vld [vmem:[%s4630_s1 + $0x70] sm:$0xff]  ;;  %v75_v11 = vld [vmem:[%s4630_s1 + $0x78] sm:$0xff] }
  0x15   :  { %v3858_v8 = vld [vmem:[%s4629_s0 + $0x8] sm:$0xff]  ;;  %3372 = vmatprep.subr.bf16.mxu0 %v3371_v3  ;;  %v3379_v9 = vpack.c.bf16 %v73_v7, %v72_v6  ;;  %v3383_v12 = vpack.c.bf16 %v75_v11, %v74_v10  ;;  %v60_v13 = vld [vmem:[%s4630_s1] sm:$0xff]  ;;  %v62_v16 = vld [vmem:[%s4630_s1 + $0x10] sm:$0xff] }
  0x16   :  { %2877 = vmatprep.mubr.msk.f32.mxu0 %vm101_vm0, %v3858_v8  ;;  %3374 = vmatpush3.bf16.msra.mxu0 %v3371_v3  ;;  %v61_v14 = vld [vmem:[%s4630_s1 + $0x8] sm:$0xff]  ;;  %v63_v17 = vld [vmem:[%s4630_s1 + $0x18] sm:$0xff]  ;;  %v3883_v18 = vld [vmem:[%s4629_s0 + $0x10] sm:$0xff] }
  0x17   :  { %3376 = vmatprep.subr.bf16.mxu0 %v3375_v5  ;;  %v3387_v15 = vpack.c.bf16 %v61_v14, %v60_v13  ;;  %v3888_v19 = vld [vmem:[%s4629_s0 + $0x18] sm:$0xff]  ;;  %v3391_v20 = vpack.c.bf16 %v63_v17, %v62_v16  ;;  %v64_v21 = vld [vmem:[%s4630_s1 + $0x20] sm:$0xff]  ;;  %v65_v22 = vld [vmem:[%s4630_s1 + $0x28] sm:$0xff] }
  0x18   :  { %v3903_v23 = vld [vmem:[%s4629_s0 + $0x20] sm:$0xff]  ;;  %v3908_v24 = vld [vmem:[%s4629_s0 + $0x28] sm:$0xff]  ;;  %v3395_v25 = vpack.c.bf16 %v65_v22, %v64_v21  ;;  %v66_v26 = vld [vmem:[%s4630_s1 + $0x30] sm:$0xff] }
  0x19   :  { %v67_v27 = vld [vmem:[%s4630_s1 + $0x38] sm:$0xff]  ;;  %v3923_v28 = vld [vmem:[%s4629_s0 + $0x30] sm:$0xff]  ;;  %v76_v31 = vld [vmem:[%s4630_s1 + $0x80] sm:$0xff] }
  0x1a   :  { %3378 = vmatpush3.bf16.msra.mxu0 %v3375_v5  ;;  %v3928_v29 = vld [vmem:[%s4629_s0 + $0x38] sm:$0xff]  ;;  %v3399_v30 = vpack.c.bf16 %v67_v27, %v66_v26  ;;  %v77_v32 = vld [vmem:[%s4630_s1 + $0x88] sm:$0xff]  ;;  %v3943_v33 = vld [vmem:[%s4629_s0 + $0x40] sm:$0xff] }
  0x1b   :  { %3380 = vmatprep.subr.bf16.mxu0 %v3379_v9  ;;  %v3948_v34 = vld [vmem:[%s4629_s0 + $0x48] sm:$0xff]  ;;  %v3403_v35 = vpack.c.bf16 %v77_v32, %v76_v31  ;;  %v3957_v36 = vld [vmem:[%s4629_s0 + $0x50] sm:$0xff]  ;;  %v3962_v37 = vld [vmem:[%s4629_s0 + $0x58] sm:$0xff] }
  0x1c   :  { %v3971_v38 = vld [vmem:[%s4629_s0 + $0x60] sm:$0xff]  ;;  %v3976_v39 = vld [vmem:[%s4629_s0 + $0x68] sm:$0xff]  ;;  %v3985_v40 = vld [vmem:[%s4629_s0 + $0x70] sm:$0xff] }
  0x1d   :  { %v3990_v41 = vld [vmem:[%s4629_s0 + $0x78] sm:$0xff]  ;;  %v3999_v42 = vld [vmem:[%s4629_s0 + $0x80] sm:$0xff]  ;;  %v78_v44 = vld [vmem:[%s4630_s1 + $0x90] sm:$0xff] }
  0x1e   :  { %3382 = vmatpush3.bf16.msra.mxu0 %v3379_v9  ;;  %v40_v43 = vld [vmem:[%s4629_s0] sm:$0xff]  ;;  %v79_v45 = vld [vmem:[%s4630_s1 + $0x98] sm:$0xff]  ;;  %v958_v47 = vld [vmem:[%s4632_s3 + $0x8] sm:$0xff] }
  0x1f   :  { %3384 = vmatprep.subr.bf16.mxu0 %v3383_v12  ;;  %v957_v46 = vld [vmem:[%s4632_s3] sm:$0xff]  ;;  %v959_v49 = vld [vmem:[%s4632_s3 + $0x10] sm:$0xff]  ;;  %v960_v50 = vld [vmem:[%s4632_s3 + $0x18] sm:$0xff]  ;;  %v3407_v51 = vpack.c.bf16 %v79_v45, %v78_v44 }
  0x20   :  { %v3467_v48 = vpack.c.bf16 %v958_v47, %v957_v46  ;;  %v80_v52 = vld [vmem:[%s4630_s1 + $0xa0] sm:$0xff]  ;;  %v3471_v53 = vpack.c.bf16 %v960_v50, %v959_v49  ;;  %v81_v54 = vld [vmem:[%s4630_s1 + $0xa8] sm:$0xff]  ;;  %v82_v59 = vld [vmem:[%s4630_s1 + $0xb0] sm:$0xff] }
  0x21   :  { %v961_v55 = vld [vmem:[%s4632_s3 + $0x20] sm:$0xff]  ;;  %v962_v56 = vld [vmem:[%s4632_s3 + $0x28] sm:$0xff]  ;;  %v3411_v57 = vpack.c.bf16 %v81_v54, %v80_v52  ;;  %v83_v60 = vld [vmem:[%s4630_s1 + $0xb8] sm:$0xff] }
  0x22   :  { %3386 = vmatpush3.bf16.msra.mxu0 %v3383_v12  ;;  %3468 = vmatprep.subr.bf16.mxu1 %v3467_v48  ;;  %v3475_v58 = vpack.c.bf16 %v962_v56, %v961_v55  ;;  %v3415_v61 = vpack.c.bf16 %v83_v60, %v82_v59  ;;  %v84_v62 = vld [vmem:[%s4630_s1 + $0xc0] sm:$0xff]  ;;  %v85_v63 = vld [vmem:[%s4630_s1 + $0xc8] sm:$0xff]  ;;  %v86_v1 = vld [vmem:[%s4630_s1 + $0xd0] sm:$0xff] }
  0x23   :  { %3388 = vmatprep.subr.bf16.mxu0 %v3387_v15  ;;  %3470 = vmatpush3.bf16.msra.mxu1 %v3467_v48  ;;  %v3419_v0 = vpack.c.bf16 %v85_v63, %v84_v62  ;;  %v87_v2 = vld [vmem:[%s4630_s1 + $0xd8] sm:$0xff]  ;;  %v88_v4 = vld [vmem:[%s4630_s1 + $0xe0] sm:$0xff]  ;;  %v89_v5 = vld [vmem:[%s4630_s1 + $0xe8] sm:$0xff] }
  0x24   :  { %3472 = vmatprep.subr.bf16.mxu1 %v3471_v53  ;;  %v3423_v3 = vpack.c.bf16 %v87_v2, %v86_v1  ;;  %v3427_v6 = vpack.c.bf16 %v89_v5, %v88_v4  ;;  %v90_v7 = vld [vmem:[%s4630_s1 + $0xf0] sm:$0xff]  ;;  %v92_v10 = vld [vmem:[%s4630_s1 + $0x100] sm:$0xff]  ;;  %v93_v11 = vld [vmem:[%s4630_s1 + $0x108] sm:$0xff] }
  0x25   :  { %2878 = vmatmul.mubr.msk.f32.vlgmr.msra.gmra.mrb[0].mxu0 %vm101_vm0, %v3883_v18  ;;  %v3435_v12 = vpack.c.bf16 %v93_v11, %v92_v10  ;;  %v57_v13 = vld [vmem:[%s4629_s0 + $0x88] sm:$0xff]  ;;  %v94_v14 = vld [vmem:[%s4630_s1 + $0x110] sm:$0xff]  ;;  %v96_v17 = vld [vmem:[%s4630_s1 + $0x120] sm:$0xff] }
  0x26   :  { %3390 = vmatpush3.bf16.msra.mxu0 %v3387_v15  ;;  %2880 = vmatprep.mubr.msk.f32.mxu0 %vm101_vm0, %v3888_v19  ;;  %v95_v15 = vld [vmem:[%s4630_s1 + $0x118] sm:$0xff]  ;;  %v966_v26 = vld [vmem:[%s4632_s3 + $0x48] sm:$0xff]  ;;  %v967_v31 = vld [vmem:[%s4632_s3 + $0x50] sm:$0xff] }
  0x27   :  { %3392 = vmatprep.subr.bf16.mxu0 %v3391_v20  ;;  %3474 = vmatpush3.bf16.msra.mxu1 %v3471_v53  ;;  %v3439_v16 = vpack.c.bf16 %v95_v15, %v94_v14  ;;  %v99_v21 = vld [vmem:[%s4630_s1 + $0x138] sm:$0xff]  ;;  %v975_v45 = vld [vmem:[%s4632_s3 + $0x90] sm:$0xff]  ;;  %v977_v52 = vld [vmem:[%s4632_s3 + $0xa0] sm:$0xff] }
  0x28   :  { %3476 = vmatprep.subr.bf16.mxu1 %v3475_v58  ;;  %v968_v32 = vld [vmem:[%s4632_s3 + $0x58] sm:$0xff]  ;;  %v978_v53 = vld [vmem:[%s4632_s3 + $0xa8] sm:$0xff]  ;;  %v979_v59 = vld [vmem:[%s4632_s3 + $0xb0] sm:$0xff] }
  0x29   :  { %2881 = vmatmul.mubr.msk.f32.gmra.mrb[2].mxu0 %vm101_vm0, %v3903_v23  ;;  %v976_v46 = vld [vmem:[%s4632_s3 + $0x98] sm:$0xff]  ;;  %v981_v2 = vld [vmem:[%s4632_s3 + $0xc0] sm:$0xff] }
  0x2a   :  { %2883 = vmatprep.mubr.msk.f32.mxu0 %vm101_vm0, %v3908_v24  ;;  %3394 = vmatpush3.bf16.msra.mxu0 %v3391_v20  ;;  %v3487_v50 = vpack.c.bf16 %v976_v46, %v975_v45  ;;  %v980_v60 = vld [vmem:[%s4632_s3 + $0xb8] sm:$0xff]  ;;  %v1733_v45 = vld [vmem:[#allocation2 + $0x40] sm:$0xff]  ;;  %v1734_v46 = vld [vmem:[#allocation2 + $0x48] sm:$0xff] }
  0x2b   :  { %3396 = vmatprep.subr.bf16.mxu0 %v3395_v25  ;;  %3478 = vmatpush3.bf16.msra.mxu1 %v3475_v58 }
  0x2d   :  { %2884 = vmatmul.mubr.msk.f32.gmra.mrb[4].mxu0 %vm101_vm0, %v3923_v28 }
  0x2e   :  { %2886 = vmatprep.mubr.msk.f32.mxu0 %vm101_vm0, %v3928_v29  ;;  %3398 = vmatpush3.bf16.msra.mxu0 %v3395_v25  ;;  %v965_v25 = vld [vmem:[%s4632_s3 + $0x40] sm:$0xff] }
  0x2f   :  { %3400 = vmatprep.subr.bf16.mxu0 %v3399_v30  ;;  %v3451_v27 = vpack.c.bf16 %v966_v26, %v965_v25  ;;  %v985_v25 = vld [vmem:[%s4632_s3 + $0xe0] sm:$0xff]  ;;  %v986_v26 = vld [vmem:[%s4632_s3 + $0xe8] sm:$0xff] }
  0x31   :  { %2887 = vmatmul.mubr.msk.f32.gmra.mrb[6].mxu0 %vm101_vm0, %v3943_v33 }
  0x32   :  { %2889 = vmatprep.mubr.msk.f32.mxu0 %vm101_vm0, %v3948_v34  ;;  %3402 = vmatpush3.bf16.msra.mxu0 %v3399_v30  ;;  %v58_v30 = vld [vmem:[%s4629_s0 + $0x90] sm:$0xff] }
  0x33   :  { %3404 = vmatprep.subr.bf16.mxu0 %v3403_v35 }
  0x35   :  { %2890 = vmatmul.mubr.msk.f32.gmra.mrb[8].mxu0 %vm101_vm0, %v3957_v36 }
  0x36   :  { %2892 = vmatprep.mubr.msk.f32.mxu0 %vm101_vm0, %v3962_v37 }
  0x39   :  { %2893 = vmatmul.mubr.msk.f32.gmra.mrb[10].mxu0 %vm101_vm0, %v3971_v38 }
  0x3a   :  { %2895 = vmatprep.mubr.msk.f32.mxu0 %vm101_vm0, %v3976_v39 }
  0x3d   :  { %2896 = vmatmul.mubr.msk.f32.gmra.mrb[12].mxu0 %vm101_vm0, %v3985_v40 }
  0x3e   :  { %2898 = vmatprep.mubr.msk.f32.mxu0 %vm101_vm0, %v3990_v41 }
  0x41   :  { %2899 = vmatmul.mubr.msk.f32.gmra.mrb[14].mxu0 %vm101_vm0, %v3999_v42 }
  0x42   :  { %2917 = vmatprep.mubr.msk.f32.mxu0 %vm101_vm0, %v40_v43  ;;  %v4259_v43 = vld [vmem:[%s4631_s2] ss:$0 sm:$0xff] }
  0x45   :  { %2918 = vmatmul.mubr.msk.f32.vlgmr.msra.gmra.mrb[0].mxu0 %vm101_vm0, %v3858_v8  ;;  %v91_v8 = vld [vmem:[%s4630_s1 + $0xf8] sm:$0xff] }
  0x46   :  { %3406 = vmatpush3.bf16.msra.mxu0 %v3403_v35  ;;  %2920 = vmatprep.mubr.msk.f32.mxu0 %vm101_vm0, %v3883_v18  ;;  %v3431_v9 = vpack.c.bf16 %v91_v8, %v90_v7  ;;  %v3455_v35 = vpack.c.bf16 %v968_v32, %v967_v31  ;;  %v3507_v32 = vpack.c.bf16 %v986_v26, %v985_v25 }
  0x47   :  { %3408 = vmatprep.subr.bf16.mxu0 %v3407_v51 }
  0x49   :  { %2921 = vmatmul.mubr.msk.f32.gmra.mrb[2].mxu0 %vm101_vm0, %v3888_v19 }
  0x4a   :  { %2923 = vmatprep.mubr.msk.f32.mxu0 %vm101_vm0, %v3903_v23  ;;  %3410 = vmatpush3.bf16.msra.mxu0 %v3407_v51 }
  0x4b   :  { %3412 = vmatprep.subr.bf16.mxu0 %v3411_v57 }
  0x4d   :  { %2924 = vmatmul.mubr.msk.f32.gmra.mrb[4].mxu0 %vm101_vm0, %v3908_v24 }
  0x4e   :  { %2926 = vmatprep.mubr.msk.f32.mxu0 %vm101_vm0, %v3923_v28  ;;  %3414 = vmatpush3.bf16.msra.mxu0 %v3411_v57  ;;  %v3491_v57 = vpack.c.bf16 %v978_v53, %v977_v52  ;;  %v1738_v52 = vld [vmem:[#allocation2 + $0x68] sm:$0xff] }
  0x4f   :  { %3416 = vmatprep.subr.bf16.mxu0 %v3415_v61 }
  0x51   :  { %2927 = vmatmul.mubr.msk.f32.gmra.mrb[6].mxu0 %vm101_vm0, %v3928_v29 }
  0x52   :  { %2929 = vmatprep.mubr.msk.f32.mxu0 %vm101_vm0, %v3943_v33  ;;  %3418 = vmatpush3.bf16.msra.mxu0 %v3415_v61 }
  0x53   :  { %3420 = vmatprep.subr.bf16.mxu0 %v3419_v0 }
  0x55   :  { %2930 = vmatmul.mubr.msk.f32.gmra.mrb[8].mxu0 %vm101_vm0, %v3948_v34 }
  0x56   :  { %2932 = vmatprep.mubr.msk.f32.mxu0 %vm101_vm0, %v3957_v36 }
  0x59   :  { %2933 = vmatmul.mubr.msk.f32.gmra.mrb[10].mxu0 %vm101_vm0, %v3962_v37 }
  0x5a   :  { %2935 = vmatprep.mubr.msk.f32.mxu0 %vm101_vm0, %v3971_v38 }
  0x5d   :  { %2936 = vmatmul.mubr.msk.f32.gmra.mrb[12].mxu0 %vm101_vm0, %v3976_v39 }
  0x5e   :  { %2938 = vmatprep.mubr.msk.f32.mxu0 %vm101_vm0, %v3985_v40 }
  0x61   :  { %2939 = vmatmul.mubr.msk.f32.gmra.mrb[14].mxu0 %vm101_vm0, %v3990_v41 }
  0x62   :  { %2957 = vmatprep.mubr.msk.f32.mxu0 %vm101_vm0, %v3883_v18  ;;  %v97_v18 = vld [vmem:[%s4630_s1 + $0x128] sm:$0xff] }
  0x63   :  { %v3443_v20 = vpack.c.bf16 %v97_v18, %v96_v17  ;;  %v983_v17 = vld [vmem:[%s4632_s3 + $0xd0] sm:$0xff]  ;;  %v984_v18 = vld [vmem:[%s4632_s3 + $0xd8] sm:$0xff] }
  0x65   :  { %2958 = vmatmul.mubr.msk.f32.vlgmr.msra.gmra.mrb[0].mxu0 %vm101_vm0, %v3888_v19 }
  0x66   :  { %3422 = vmatpush3.bf16.msra.mxu0 %v3419_v0  ;;  %2960 = vmatprep.mubr.msk.f32.mxu0 %vm101_vm0, %v3903_v23  ;;  %v3495_v0 = vpack.c.bf16 %v980_v60, %v979_v59 }
  0x67   :  { %3424 = vmatprep.subr.bf16.mxu0 %v3423_v3 }
  0x69   :  { %2961 = vmatmul.mubr.msk.f32.gmra.mrb[2].mxu0 %vm101_vm0, %v3908_v24 }
  0x6a   :  { %2963 = vmatprep.mubr.msk.f32.mxu0 %vm101_vm0, %v3923_v28  ;;  %3426 = vmatpush3.bf16.msra.mxu0 %v3423_v3  ;;  %v982_v3 = vld [vmem:[%s4632_s3 + $0xc8] sm:$0xff] }
  0x6b   :  { %3428 = vmatprep.subr.bf16.mxu0 %v3427_v6  ;;  %v3499_v7 = vpack.c.bf16 %v982_v3, %v981_v2 }
  0x6d   :  { %2964 = vmatmul.mubr.msk.f32.gmra.mrb[4].mxu0 %vm101_vm0, %v3928_v29 }
  0x6e   :  { %2966 = vmatprep.mubr.msk.f32.mxu0 %vm101_vm0, %v3943_v33  ;;  %3430 = vmatpush3.bf16.msra.mxu0 %v3427_v6 }
  0x6f   :  { %3432 = vmatprep.subr.bf16.mxu0 %v3431_v9 }
  0x71   :  { %2967 = vmatmul.mubr.msk.f32.gmra.mrb[6].mxu0 %vm101_vm0, %v3948_v34 }
  0x72   :  { %2969 = vmatprep.mubr.msk.f32.mxu0 %vm101_vm0, %v3957_v36  ;;  %3434 = vmatpush3.bf16.msra.mxu0 %v3431_v9 }
  0x73   :  { %3436 = vmatprep.subr.bf16.mxu0 %v3435_v12 }
  0x75   :  { %2970 = vmatmul.mubr.msk.f32.gmra.mrb[8].mxu0 %vm101_vm0, %v3962_v37 }
  0x76   :  { %2972 = vmatprep.mubr.msk.f32.mxu0 %vm101_vm0, %v3971_v38 }
  0x79   :  { %2973 = vmatmul.mubr.msk.f32.gmra.mrb[10].mxu0 %vm101_vm0, %v3976_v39 }
  0x7a   :  { %2975 = vmatprep.mubr.msk.f32.mxu0 %vm101_vm0, %v3985_v40 }
  0x7d   :  { %2976 = vmatmul.mubr.msk.f32.gmra.mrb[12].mxu0 %vm101_vm0, %v3990_v41 }
  0x7e   :  { %2978 = vmatprep.mubr.msk.f32.mxu0 %vm101_vm0, %v3999_v42 }
  0x81   :  { %2979 = vmatmul.mubr.msk.f32.gmra.mrb[14].mxu0 %vm101_vm0, %v57_v13 }
  0x82   :  { %2997 = vmatprep.mubr.msk.f32.mxu0 %vm101_vm0, %v3888_v19  ;;  %v98_v19 = vld [vmem:[%s4630_s1 + $0x130] sm:$0xff] }
  0x83   :  { %v3447_v22 = vpack.c.bf16 %v99_v21, %v98_v19  ;;  %v3503_v21 = vpack.c.bf16 %v984_v18, %v983_v17  ;;  %v1727_v17 = vld [vmem:[#allocation2 + $0x10] sm:$0xff]  ;;  %v1728_v18 = vld [vmem:[#allocation2 + $0x18] sm:$0xff] }
  0x85   :  { %2998 = vmatmul.mubr.msk.f32.vlgmr.msra.gmra.mrb[0].mxu0 %vm101_vm0, %v3903_v23 }
  0x86   :  { %3438 = vmatpush3.bf16.msra.mxu0 %v3435_v12  ;;  %3000 = vmatprep.mubr.msk.f32.mxu0 %vm101_vm0, %v3908_v24 }
  0x87   :  { %3440 = vmatprep.subr.bf16.mxu0 %v3439_v16 }
  0x89   :  { %3001 = vmatmul.mubr.msk.f32.gmra.mrb[2].mxu0 %vm101_vm0, %v3923_v28 }
  0x8a   :  { %3003 = vmatprep.mubr.msk.f32.mxu0 %vm101_vm0, %v3928_v29  ;;  %3442 = vmatpush3.bf16.msra.mxu0 %v3439_v16 }
  0x8b   :  { %3444 = vmatprep.subr.bf16.mxu0 %v3443_v20 }
  0x8d   :  { %3004 = vmatmul.mubr.msk.f32.gmra.mrb[4].mxu0 %vm101_vm0, %v3943_v33 }
  0x8e   :  { %3006 = vmatprep.mubr.msk.f32.mxu0 %vm101_vm0, %v3948_v34  ;;  %3446 = vmatpush3.bf16.msra.mxu0 %v3443_v20 }
  0x8f   :  { %3448 = vmatprep.subr.bf16.mxu0 %v3447_v22 }
  0x91   :  { %3007 = vmatmul.mubr.msk.f32.gmra.mrb[6].mxu0 %vm101_vm0, %v3957_v36 }
  0x92   :  { %3009 = vmatprep.mubr.msk.f32.mxu0 %vm101_vm0, %v3962_v37  ;;  %3450 = vmatpush3.bf16.msra.mxu0 %v3447_v22 }
  0x93   :  { %3452 = vmatprep.subr.bf16.mxu0 %v3451_v27 }
  0x95   :  { %3010 = vmatmul.mubr.msk.f32.gmra.mrb[8].mxu0 %vm101_vm0, %v3971_v38 }
  0x96   :  { %3012 = vmatprep.mubr.msk.f32.mxu0 %vm101_vm0, %v3976_v39 }
  0x99   :  { %3013 = vmatmul.mubr.msk.f32.gmra.mrb[10].mxu0 %vm101_vm0, %v3985_v40 }
  0x9a   :  { %3015 = vmatprep.mubr.msk.f32.mxu0 %vm101_vm0, %v3990_v41 }
  0x9d   :  { %3016 = vmatmul.mubr.msk.f32.gmra.mrb[12].mxu0 %vm101_vm0, %v3999_v42 }
  0x9e   :  { %3018 = vmatprep.mubr.msk.f32.mxu0 %vm101_vm0, %v57_v13 }
  0xa1   :  { %3019 = vmatmul.mubr.msk.f32.gmra.mrb[14].mxu0 %vm101_vm0, %v58_v30 }
  0xa2   :  { %3037 = vmatprep.mubr.msk.f32.mxu0 %vm101_vm0, %v3903_v23  ;;  %v59_v23 = vld [vmem:[%s4629_s0 + $0x98] sm:$0xff] }
  0xa5   :  { %3038 = vmatmul.mubr.msk.f32.vlgmr.msra.gmra.mrb[0].mxu0 %vm101_vm0, %v3908_v24  ;;  %v969_v24 = vld [vmem:[%s4632_s3 + $0x60] sm:$0xff] }
  0xa6   :  { %3040 = vmatprep.mubr.msk.f32.mxu0 %vm101_vm0, %v3923_v28  ;;  %3454 = vmatpush3.bf16.msra.mxu0 %v3451_v27  ;;  %v970_v28 = vld [vmem:[%s4632_s3 + $0x68] sm:$0xff] }
  0xa7   :  { %3456 = vmatprep.subr.bf16.mxu0 %v3455_v35 }
  0xa9   :  { %3041 = vmatmul.mubr.msk.f32.gmra.mrb[2].mxu0 %vm101_vm0, %v3928_v29  ;;  %v3459_v29 = vpack.c.bf16 %v970_v28, %v969_v24  ;;  %v989_v28 = vld [vmem:[%s4632_s3 + $0x100] sm:$0xff] }
  0xaa   :  { %3043 = vmatprep.mubr.msk.f32.mxu0 %vm101_vm0, %v3943_v33  ;;  %3458 = vmatpush3.bf16.msra.mxu0 %v3455_v35  ;;  %v963_v33 = vld [vmem:[%s4632_s3 + $0x30] sm:$0xff] }
  0xab   :  { %3460 = vmatprep.subr.bf16.mxu0 %v3459_v29  ;;  %v987_v35 = vld [vmem:[%s4632_s3 + $0xf0] sm:$0xff] }
  0xad   :  { %3044 = vmatmul.mubr.msk.f32.gmra.mrb[4].mxu0 %vm101_vm0, %v3948_v34  ;;  %v964_v34 = vld [vmem:[%s4632_s3 + $0x38] sm:$0xff] }
  0xae   :  { %3046 = vmatprep.mubr.msk.f32.mxu0 %vm101_vm0, %v3957_v36  ;;  %v3479_v36 = vpack.c.bf16 %v964_v34, %v963_v33  ;;  %3462 = vmatpush3.bf16.msra.mxu0 %v3459_v29  ;;  %v990_v29 = vld [vmem:[%s4632_s3 + $0x108] sm:$0xff] }
  0xaf   :  { %v3515_v33 = vpack.c.bf16 %v990_v29, %v989_v28 }
  0xb0   :  { %3480 = vmatprep.subr.bf16.mxu1 %v3479_v36 }
  0xb1   :  { %3047 = vmatmul.mubr.msk.f32.gmra.mrb[6].mxu0 %vm101_vm0, %v3962_v37  ;;  %v971_v37 = vld [vmem:[%s4632_s3 + $0x70] sm:$0xff]  ;;  %3482 = vmatpush3.bf16.msra.mxu1 %v3479_v36 }
  0xb2   :  { %3049 = vmatprep.mubr.msk.f32.mxu0 %vm101_vm0, %v3971_v38  ;;  %v972_v38 = vld [vmem:[%s4632_s3 + $0x78] sm:$0xff]  ;;  %v991_v36 = vld [vmem:[%s4632_s3 + $0x110] sm:$0xff] }
  0xb5   :  { %3050 = vmatmul.mubr.msk.f32.gmra.mrb[8].mxu0 %vm101_vm0, %v3976_v39  ;;  %v3463_v39 = vpack.c.bf16 %v972_v38, %v971_v37  ;;  %v992_v37 = vld [vmem:[%s4632_s3 + $0x118] sm:$0xff] }
  0xb6   :  { %3052 = vmatprep.mubr.msk.f32.mxu0 %vm101_vm0, %v3985_v40  ;;  %v973_v40 = vld [vmem:[%s4632_s3 + $0x80] sm:$0xff]  ;;  %v3519_v38 = vpack.c.bf16 %v992_v37, %v991_v36  ;;  %v1732_v36 = vld [vmem:[#allocation2 + $0x38] sm:$0xff] }
  0xb7   :  { %3464 = vmatprep.subr.bf16.mxu0 %v3463_v39 }
  0xb8   :  { %3466 = vmatpush3.bf16.msra.mxu0 %v3463_v39  ;;  %v993_v39 = vld [vmem:[%s4632_s3 + $0x120] sm:$0xff] }
  0xb9   :  { %3053 = vmatmul.mubr.msk.f32.gmra.mrb[10].mxu0 %vm101_vm0, %v3990_v41  ;;  %v974_v41 = vld [vmem:[%s4632_s3 + $0x88] sm:$0xff] }
  0xba   :  { %3055 = vmatprep.mubr.msk.f32.mxu0 %vm101_vm0, %v3999_v42  ;;  %v3483_v42 = vpack.c.bf16 %v974_v41, %v973_v40  ;;  %v994_v40 = vld [vmem:[%s4632_s3 + $0x128] sm:$0xff] }
  0xbb   :  { %v3523_v41 = vpack.c.bf16 %v994_v40, %v993_v39 }
  0xbc   :  { %3484 = vmatprep.subr.bf16.mxu1 %v3483_v42 }
  0xbd   :  { %3056 = vmatmul.mubr.msk.f32.gmra.mrb[12].mxu0 %vm101_vm0, %v57_v13 }
  0xbe   :  { %3058 = vmatprep.mubr.msk.f32.mxu0 %vm101_vm0, %v58_v30 }
  0xc1   :  { %3059 = vmatmul.mubr.msk.f32.gmra.mrb[14].mxu0 %vm101_vm0, %v59_v23  ;;  %v988_v23 = vld [vmem:[%s4632_s3 + $0xf8] sm:$0xff] }
  0xc2   :  { %v3511_v24 = vpack.c.bf16 %v988_v23, %v987_v35 }
 0x178   :  { %v3039_v44 = vpop.f32.mrb[0].mxu0 }
 0x179   :  { %v942_v47 = vadd.f32 %v3039_v44, %v4259_v43  ;;  %v840_v48 = vpop.f32.mrb[1].mxu0 }
 0x17a   :  { %v941_v49 = vadd.f32 %v4259_v43, %v840_v48  ;;  %v3531_v48 = vpack.c.bf16 %v1734_v46, %v1733_v45  ;;  %v1742_v45 = vld [vmem:[#allocation2 + $0x88] sm:$0xff] }
 0x17b   :  { %3077 = vmatprep.mubr.msk.f32.mxu0 %vm101_vm0, %v942_v47 }
 0x17c   :  { %v3042_v51 = vpop.f32.mrb[2].mxu0  ;;  %3111 = vmatprep.mubr.msk.f32.mxu1 %vm101_vm0, %v941_v49  ;;  %v1736_v49 = vld [vmem:[#allocation2 + $0x58] sm:$0xff] }
 0x17d   :  { %v850_v54 = vpop.f32.mrb[3].mxu0  ;;  %3112 = vmatmul.mubr.msk.f32.vlgmr.msra.gmra.mrb[0].mxu1 %vm101_vm0, %v942_v47  ;;  %v4280_v56 = vadd.f32 %v3042_v51, %v4259_v43  ;;  %v1735_v47 = vld [vmem:[#allocation2 + $0x50] sm:$0xff]  ;;  %v1737_v51 = vld [vmem:[#allocation2 + $0x60] sm:$0xff] }
 0x17e   :  { %v943_v55 = vadd.f32 %v4259_v43, %v850_v54  ;;  %3486 = vmatpush3.bf16.msra.mxu1 %v3483_v42  ;;  %v995_v42 = vld [vmem:[%s4632_s3 + $0x130] sm:$0xff]  ;;  %v3539_v53 = vpack.c.bf16 %v1738_v52, %v1737_v51 }
 0x17f   :  { %3488 = vmatprep.subr.bf16.mxu1 %v3487_v50  ;;  %v1739_v54 = vld [vmem:[#allocation2 + $0x70] sm:$0xff] }
 0x180   :  { %v3045_v58 = vpop.f32.mrb[4].mxu0  ;;  %3078 = vmatmul.mubr.msk.f32.vlgmr.msra.gmra.mrb[16].mxu0 %vm101_vm0, %v943_v55  ;;  %3114 = vmatprep.mubr.msk.f32.mxu1 %vm101_vm0, %v943_v55 }
 0x181   :  { %v860_v61 = vpop.f32.mrb[5].mxu0  ;;  %3080 = vmatprep.mubr.msk.f32.mxu0 %vm101_vm0, %v4280_v56  ;;  %3115 = vmatmul.mubr.msk.f32.gmra.mrb[2].mxu1 %vm101_vm0, %v4280_v56  ;;  %v4298_v63 = vadd.f32 %v3045_v58, %v4259_v43  ;;  %v1726_v58 = vld [vmem:[#allocation2 + $0x8] sm:$0xff] }
 0x182   :  { %v4295_v62 = vadd.f32 %v4259_v43, %v860_v61  ;;  %3490 = vmatpush3.bf16.msra.mxu1 %v3487_v50  ;;  %v3535_v50 = vpack.c.bf16 %v1736_v49, %v1735_v47 }
 0x183   :  { %3492 = vmatprep.subr.bf16.mxu1 %v3491_v57 }
 0x184   :  { %v3048_v1 = vpop.f32.mrb[6].mxu0  ;;  %3081 = vmatmul.mubr.msk.f32.gmra.mrb[18].mxu0 %vm101_vm0, %v4295_v62  ;;  %3117 = vmatprep.mubr.msk.f32.mxu1 %vm101_vm0, %v4295_v62 }
 0x185   :  { %v870_v4 = vpop.f32.mrb[7].mxu0  ;;  %3083 = vmatprep.mubr.msk.f32.mxu0 %vm101_vm0, %v4298_v63  ;;  %3118 = vmatmul.mubr.msk.f32.gmra.mrb[4].mxu1 %vm101_vm0, %v4298_v63  ;;  %v4318_v6 = vadd.f32 %v3048_v1, %v4259_v43 }
 0x186   :  { %v4315_v5 = vadd.f32 %v4259_v43, %v870_v4  ;;  %3494 = vmatpush3.bf16.msra.mxu1 %v3491_v57  ;;  %v1725_v57 = vld [vmem:[#allocation2] sm:$0xff] }
 0x187   :  { %3496 = vmatprep.subr.bf16.mxu1 %v3495_v0  ;;  %v3547_v59 = vpack.c.bf16 %v1726_v58, %v1725_v57 }
 0x188   :  { %v3051_v8 = vpop.f32.mrb[8].mxu0  ;;  %3084 = vmatmul.mubr.msk.f32.gmra.mrb[20].mxu0 %vm101_vm0, %v4315_v5  ;;  %3120 = vmatprep.mubr.msk.f32.mxu1 %vm101_vm0, %v4315_v5 }
 0x189   :  { %v880_v9 = vpop.f32.mrb[9].mxu0  ;;  %3086 = vmatprep.mubr.msk.f32.mxu0 %vm101_vm0, %v4318_v6  ;;  %3121 = vmatmul.mubr.msk.f32.gmra.mrb[6].mxu1 %vm101_vm0, %v4318_v6  ;;  %v4332_v11 = vadd.f32 %v3051_v8, %v4259_v43  ;;  %v4481_v8 = vld [vmem:[%s4633_s4] ss:$0 sm:$0xff] }
 0x18a   :  { %v4329_v10 = vadd.f32 %v4259_v43, %v880_v9  ;;  %3498 = vmatpush3.bf16.msra.mxu1 %v3495_v0 }
 0x18b   :  { %3500 = vmatprep.subr.bf16.mxu1 %v3499_v7 }
 0x18c   :  { %v3054_v12 = vpop.f32.mrb[10].mxu0  ;;  %3087 = vmatmul.mubr.msk.f32.gmra.mrb[22].mxu0 %vm101_vm0, %v4329_v10  ;;  %3123 = vmatprep.mubr.msk.f32.mxu1 %vm101_vm0, %v4329_v10 }
 0x18d   :  { %v890_v13 = vpop.f32.mrb[11].mxu0  ;;  %3089 = vmatprep.mubr.msk.f32.mxu0 %vm101_vm0, %v4332_v11  ;;  %3124 = vmatmul.mubr.msk.f32.gmra.mrb[8].mxu1 %vm101_vm0, %v4332_v11  ;;  %v4346_v15 = vadd.f32 %v3054_v12, %v4259_v43 }
 0x18e   :  { %v4343_v14 = vadd.f32 %v4259_v43, %v890_v13 }
 0x190   :  { %v3057_v16 = vpop.f32.mrb[12].mxu0  ;;  %3090 = vmatmul.mubr.msk.f32.gmra.mrb[24].mxu0 %vm101_vm0, %v4343_v14  ;;  %3126 = vmatprep.mubr.msk.f32.mxu1 %vm101_vm0, %v4343_v14 }
 0x191   :  { %v900_v20 = vpop.f32.mrb[13].mxu0  ;;  %3092 = vmatprep.mubr.msk.f32.mxu0 %vm101_vm0, %v4346_v15  ;;  %3127 = vmatmul.mubr.msk.f32.gmra.mrb[10].mxu1 %vm101_vm0, %v4346_v15  ;;  %v954_v34 = vadd.f32 %v3057_v16, %v4259_v43 }
 0x192   :  { %v4363_v19 = vadd.f32 %v4259_v43, %v900_v20  ;;  %3145 = vmatprep.mubr.msk.f32.mxu1 %vm101_vm0, %v943_v55  ;;  %v1740_v55 = vld [vmem:[#allocation2 + $0x78] sm:$0xff] }
 0x194   :  { %v3060_v22 = vpop.f32.mrb[14].mxu0  ;;  %3093 = vmatmul.mubr.msk.f32.gmra.mrb[26].mxu0 %vm101_vm0, %v4363_v19 }
 0x195   :  { %v4375_v27 = vadd.f32 %v3060_v22, %v4259_v43  ;;  %v910_v30 = vpop.f32.mrb[15].mxu0  ;;  %3146 = vmatmul.mubr.msk.f32.vlgmr.msra.gmra.mrb[0].mxu1 %vm101_vm0, %v4280_v56  ;;  %v3551_v22 = vpack.c.bf16 %v1728_v18, %v1727_v17  ;;  %v1759_v18 = vld [vmem:[#allocation2 + $0x110] sm:$0xff] }
 0x196   :  { %v4380_v31 = vadd.f32 %v4259_v43, %v910_v30  ;;  %3148 = vmatprep.mubr.msk.f32.mxu1 %vm101_vm0, %v4295_v62  ;;  %3502 = vmatpush3.bf16.msra.mxu1 %v3499_v7  ;;  %v996_v43 = vld [vmem:[%s4632_s3 + $0x138] sm:$0xff]  ;;  %v1729_v30 = vld [vmem:[#allocation2 + $0x20] sm:$0xff] }
 0x197   :  { %3504 = vmatprep.subr.bf16.mxu1 %v3503_v21  ;;  %v3527_v44 = vpack.c.bf16 %v996_v43, %v995_v42 }
 0x199   :  { %3149 = vmatmul.mubr.msk.f32.gmra.mrb[2].mxu1 %vm101_vm0, %v4298_v63 }
 0x19a   :  { %3151 = vmatprep.mubr.msk.f32.mxu1 %vm101_vm0, %v4315_v5  ;;  %3506 = vmatpush3.bf16.msra.mxu1 %v3503_v21 }
 0x19b   :  { %3508 = vmatprep.subr.bf16.mxu1 %v3507_v32 }
 0x19d   :  { %3152 = vmatmul.mubr.msk.f32.gmra.mrb[4].mxu1 %vm101_vm0, %v4318_v6 }
 0x19e   :  { %3154 = vmatprep.mubr.msk.f32.mxu1 %vm101_vm0, %v4329_v10  ;;  %3510 = vmatpush3.bf16.msra.mxu1 %v3507_v32 }
 0x19f   :  { %3512 = vmatprep.subr.bf16.mxu1 %v3511_v24 }
 0x1a1   :  { %3155 = vmatmul.mubr.msk.f32.gmra.mrb[6].mxu1 %vm101_vm0, %v4332_v11 }
 0x1a2   :  { %3157 = vmatprep.mubr.msk.f32.mxu1 %vm101_vm0, %v4343_v14  ;;  %3514 = vmatpush3.bf16.msra.mxu1 %v3511_v24 }
 0x1a3   :  { %3516 = vmatprep.subr.bf16.mxu1 %v3515_v33 }
 0x1a5   :  { %3158 = vmatmul.mubr.msk.f32.gmra.mrb[8].mxu1 %vm101_vm0, %v4346_v15 }
 0x1a6   :  { %3160 = vmatprep.mubr.msk.f32.mxu1 %vm101_vm0, %v4363_v19 }
 0x1a9   :  { %3161 = vmatmul.mubr.msk.f32.gmra.mrb[10].mxu1 %vm101_vm0, %v954_v34 }
 0x1aa   :  { %3179 = vmatprep.mubr.msk.f32.mxu1 %vm101_vm0, %v4280_v56  ;;  %v3543_v56 = vpack.c.bf16 %v1740_v55, %v1739_v54  ;;  %v1744_v54 = vld [vmem:[#allocation2 + $0x98] sm:$0xff] }
 0x1ad   :  { %3180 = vmatmul.mubr.msk.f32.vlgmr.msra.gmra.mrb[0].mxu1 %vm101_vm0, %v4295_v62 }
 0x1ae   :  { %3182 = vmatprep.mubr.msk.f32.mxu1 %vm101_vm0, %v4298_v63  ;;  %3518 = vmatpush3.bf16.msra.mxu1 %v3515_v33 }
 0x1af   :  { %3520 = vmatprep.subr.bf16.mxu1 %v3519_v38 }
 0x1b1   :  { %3183 = vmatmul.mubr.msk.f32.gmra.mrb[2].mxu1 %vm101_vm0, %v4315_v5 }
 0x1b2   :  { %3185 = vmatprep.mubr.msk.f32.mxu1 %vm101_vm0, %v4318_v6  ;;  %3522 = vmatpush3.bf16.msra.mxu1 %v3519_v38 }
 0x1b3   :  { %3524 = vmatprep.subr.bf16.mxu1 %v3523_v41 }
 0x1b5   :  { %3186 = vmatmul.mubr.msk.f32.gmra.mrb[4].mxu1 %vm101_vm0, %v4329_v10 }
 0x1b6   :  { %3188 = vmatprep.mubr.msk.f32.mxu1 %vm101_vm0, %v4332_v11  ;;  %3526 = vmatpush3.bf16.msra.mxu1 %v3523_v41 }
 0x1b7   :  { %3528 = vmatprep.subr.bf16.mxu1 %v3527_v44 }
 0x1b9   :  { %3189 = vmatmul.mubr.msk.f32.gmra.mrb[6].mxu1 %vm101_vm0, %v4343_v14 }
 0x1ba   :  { %3191 = vmatprep.mubr.msk.f32.mxu1 %vm101_vm0, %v4346_v15  ;;  %3530 = vmatpush3.bf16.msra.mxu1 %v3527_v44  ;;  %v1741_v44 = vld [vmem:[#allocation2 + $0x80] sm:$0xff] }
 0x1bb   :  { %3532 = vmatprep.subr.bf16.mxu1 %v3531_v48  ;;  %v3563_v49 = vpack.c.bf16 %v1742_v45, %v1741_v44 }
 0x1bd   :  { %3192 = vmatmul.mubr.msk.f32.gmra.mrb[8].mxu1 %vm101_vm0, %v4363_v19 }
 0x1be   :  { %3194 = vmatprep.mubr.msk.f32.mxu1 %vm101_vm0, %v954_v34 }
 0x1c1   :  { %3195 = vmatmul.mubr.msk.f32.gmra.mrb[10].mxu1 %vm101_vm0, %v4380_v31 }
 0x1c2   :  { %3213 = vmatprep.mubr.msk.f32.mxu1 %vm101_vm0, %v4295_v62 }
 0x1c5   :  { %3214 = vmatmul.mubr.msk.f32.vlgmr.msra.gmra.mrb[0].mxu1 %vm101_vm0, %v4298_v63 }
 0x1c6   :  { %3216 = vmatprep.mubr.msk.f32.mxu1 %vm101_vm0, %v4315_v5  ;;  %3534 = vmatpush3.bf16.msra.mxu1 %v3531_v48 }
 0x1c7   :  { %3536 = vmatprep.subr.bf16.mxu1 %v3535_v50 }
 0x1c9   :  { %3217 = vmatmul.mubr.msk.f32.gmra.mrb[2].mxu1 %vm101_vm0, %v4318_v6 }
 0x1ca   :  { %3219 = vmatprep.mubr.msk.f32.mxu1 %vm101_vm0, %v4329_v10  ;;  %3538 = vmatpush3.bf16.msra.mxu1 %v3535_v50 }
 0x1cb   :  { %3540 = vmatprep.subr.bf16.mxu1 %v3539_v53 }
 0x1cd   :  { %3220 = vmatmul.mubr.msk.f32.gmra.mrb[4].mxu1 %vm101_vm0, %v4332_v11 }
 0x1ce   :  { %3222 = vmatprep.mubr.msk.f32.mxu1 %vm101_vm0, %v4343_v14  ;;  %3542 = vmatpush3.bf16.msra.mxu1 %v3539_v53  ;;  %v1743_v53 = vld [vmem:[#allocation2 + $0x90] sm:$0xff] }
 0x1cf   :  { %3544 = vmatprep.subr.bf16.mxu1 %v3543_v56  ;;  %v3567_v58 = vpack.c.bf16 %v1744_v54, %v1743_v53 }
 0x1d1   :  { %3223 = vmatmul.mubr.msk.f32.gmra.mrb[6].mxu1 %vm101_vm0, %v4346_v15 }
 0x1d2   :  { %3225 = vmatprep.mubr.msk.f32.mxu1 %vm101_vm0, %v4363_v19  ;;  %3546 = vmatpush3.bf16.msra.mxu1 %v3543_v56 }
 0x1d3   :  { %3548 = vmatprep.subr.bf16.mxu1 %v3547_v59 }
 0x1d5   :  { %3226 = vmatmul.mubr.msk.f32.gmra.mrb[8].mxu1 %vm101_vm0, %v954_v34  ;;  %v1731_v34 = vld [vmem:[#allocation2 + $0x30] sm:$0xff] }
 0x1d6   :  { %3228 = vmatprep.mubr.msk.f32.mxu1 %vm101_vm0, %v4380_v31  ;;  %v1730_v31 = vld [vmem:[#allocation2 + $0x28] sm:$0xff]  ;;  %v3559_v40 = vpack.c.bf16 %v1732_v36, %v1731_v34 }
 0x1d7   :  { %v3555_v24 = vpack.c.bf16 %v1730_v31, %v1729_v30  ;;  %v2560_v30 = vld [vmem:[%s4635_s6] ss:$0 sm:$0xff] }
 0x1d9   :  { %3229 = vmatmul.mubr.msk.f32.gmra.mrb[10].mxu1 %vm101_vm0, %v4375_v27 }
 0x253   :  { %v3079_v60 = vpop.f32.mrb[16].mxu0 }
 0x254   :  { %v1100_v61 = vpop.f32.mrb[17].mxu0 }
 0x257   :  { %v3082_v62 = vpop.f32.mrb[18].mxu0 }
 0x258   :  { %v1110_v63 = vpop.f32.mrb[19].mxu0 }
 0x25b   :  { %v3085_v0 = vpop.f32.mrb[20].mxu0 }
 0x25c   :  { %v1120_v1 = vpop.f32.mrb[21].mxu0 }
 0x25f   :  { %v3088_v2 = vpop.f32.mrb[22].mxu0 }
 0x260   :  { %v1130_v3 = vpop.f32.mrb[23].mxu0 }
 0x263   :  { %v3091_v4 = vpop.f32.mrb[24].mxu0 }
 0x264   :  { %v1140_v5 = vpop.f32.mrb[25].mxu0 }
 0x267   :  { %v3094_v6 = vpop.f32.mrb[26].mxu0 }
 0x268   :  { %v1150_v7 = vpop.f32.mrb[27].mxu0 }
 0x298   :  { %v3215_v9 = vpop.f32.mrb[0].mxu1 }
 0x299   :  { %v3611_v10 = vadd.f32 %v3215_v9, %v3079_v60  ;;  %v1636_v11 = vpop.f32.mrb[1].mxu1  ;;  %v1746_v60 = vld [vmem:[#allocation2 + $0xa8] sm:$0xff] }
 0x29a   :  { %v3612_v12 = vadd.f32 %v1636_v11, %v1100_v61  ;;  %v1754_v9 = vld [vmem:[#allocation2 + $0xe8] sm:$0xff]  ;;  %v1755_v11 = vld [vmem:[#allocation2 + $0xf0] sm:$0xff] }
 0x29b   :  { %v4484_v13 = vadd.f32 %v3611_v10, %v4481_v8 }
 0x29c   :  { %v3218_v14 = vpop.f32.mrb[2].mxu1  ;;  %v1713_v50 = vadd.f32 %v3612_v12, %v4481_v8  ;;  %v1756_v12 = vld [vmem:[#allocation2 + $0xf8] sm:$0xff] }
 0x29d   :  { %v3613_v15 = vadd.f32 %v3218_v14, %v3082_v62  ;;  %v1646_v16 = vpop.f32.mrb[3].mxu1  ;;  %3247 = vmatprep.mubr.msk.f32.mxu1 %vm101_vm0, %v4484_v13  ;;  %v1747_v62 = vld [vmem:[#allocation2 + $0xb0] sm:$0xff]  ;;  %v1757_v14 = vld [vmem:[#allocation2 + $0x100] sm:$0xff] }
 0x29e   :  { %v3614_v20 = vadd.f32 %v1646_v16, %v1110_v63  ;;  %v1748_v63 = vld [vmem:[#allocation2 + $0xb8] sm:$0xff] }
 0x29f   :  { %v4492_v25 = vadd.f32 %v3613_v15, %v4481_v8  ;;  %v1758_v15 = vld [vmem:[#allocation2 + $0x108] sm:$0xff] }
 0x2a0   :  { %v4489_v19 = vadd.f32 %v3614_v20, %v4481_v8  ;;  %v3221_v21 = vpop.f32.mrb[4].mxu1  ;;  %v3595_v17 = vpack.c.bf16 %v1758_v15, %v1757_v14  ;;  %v1760_v20 = vld [vmem:[#allocation2 + $0x118] sm:$0xff] }
 0x2a1   :  { %v3615_v26 = vadd.f32 %v3221_v21, %v3085_v0  ;;  %v1656_v27 = vpop.f32.mrb[5].mxu1  ;;  %v3575_v0 = vpack.c.bf16 %v1748_v63, %v1747_v62  ;;  %v1761_v21 = vld [vmem:[#allocation2 + $0x120] sm:$0xff] }
 0x2a2   :  { %v3616_v32 = vadd.f32 %v1656_v27, %v1120_v1  ;;  %3248 = vmatmul.mubr.msk.f32.vlgmr.msra.gmra.mrb[12].mxu1 %vm101_vm0, %v4489_v19  ;;  %v1749_v1 = vld [vmem:[#allocation2 + $0xc0] sm:$0xff]  ;;  %v1764_v27 = vld [vmem:[#allocation2 + $0x138] sm:$0xff] }
 0x2a3   :  { %3250 = vmatprep.mubr.msk.f32.mxu1 %vm101_vm0, %v4492_v25  ;;  %3550 = vmatpush3.bf16.msra.mxu1 %v3547_v59  ;;  %v4502_v28 = vadd.f32 %v3615_v26, %v4481_v8  ;;  %v1745_v59 = vld [vmem:[#allocation2 + $0xa0] sm:$0xff]  ;;  %v1763_v26 = vld [vmem:[#allocation2 + $0x130] sm:$0xff] }
 0x2a4   :  { %v4499_v35 = vadd.f32 %v3616_v32, %v4481_v8  ;;  %v3224_v23 = vpop.f32.mrb[6].mxu1  ;;  %3552 = vmatprep.subr.bf16.mxu1 %v3551_v22  ;;  %v3571_v61 = vpack.c.bf16 %v1746_v60, %v1745_v59 }
 0x2a5   :  { %v3617_v29 = vadd.f32 %v3224_v23, %v3088_v2  ;;  %v1666_v33 = vpop.f32.mrb[7].mxu1  ;;  %v1750_v2 = vld [vmem:[#allocation2 + $0xc8] sm:$0xff] }
 0x2a6   :  { %v3618_v37 = vadd.f32 %v1666_v33, %v1130_v3  ;;  %3251 = vmatmul.mubr.msk.f32.gmra.mrb[14].mxu1 %vm101_vm0, %v4499_v35  ;;  %v3579_v3 = vpack.c.bf16 %v1750_v2, %v1749_v1 }
 0x2a7   :  { %3253 = vmatprep.mubr.msk.f32.mxu1 %vm101_vm0, %v4502_v28  ;;  %3554 = vmatpush3.bf16.msra.mxu1 %v3551_v22  ;;  %v4512_v41 = vadd.f32 %v3617_v29, %v4481_v8  ;;  %v1762_v22 = vld [vmem:[#allocation2 + $0x128] sm:$0xff] }
 0x2a8   :  { %v4509_v38 = vadd.f32 %v3618_v37, %v4481_v8  ;;  %v3227_v39 = vpop.f32.mrb[8].mxu1  ;;  %3556 = vmatprep.subr.bf16.mxu1 %v3555_v24 }
 0x2a9   :  { %v4514_v42 = vadd.f32 %v3227_v39, %v3091_v4  ;;  %v1676_v43 = vpop.f32.mrb[9].mxu1  ;;  %v1751_v4 = vld [vmem:[#allocation2 + $0xd0] sm:$0xff] }
 0x2aa   :  { %v3620_v46 = vadd.f32 %v1676_v43, %v1140_v5  ;;  %3254 = vmatmul.mubr.msk.f32.gmra.mrb[16].mxu1 %vm101_vm0, %v4509_v38  ;;  %v1752_v5 = vld [vmem:[#allocation2 + $0xd8] sm:$0xff] }
 0x2ab   :  { %3256 = vmatprep.mubr.msk.f32.mxu1 %vm101_vm0, %v4512_v41  ;;  %3558 = vmatpush3.bf16.msra.mxu1 %v3555_v24  ;;  %v1722_v16 = vadd.f32 %v4514_v42, %v4481_v8 }
 0x2ac   :  { %v4521_v47 = vadd.f32 %v3620_v46, %v4481_v8  ;;  %v3230_v48 = vpop.f32.mrb[10].mxu1  ;;  %3560 = vmatprep.subr.bf16.mxu1 %v3559_v40 }
 0x2ad   :  { %v3621_v51 = vadd.f32 %v3230_v48, %v3094_v6  ;;  %v1686_v52 = vpop.f32.mrb[11].mxu1  ;;  %v3583_v6 = vpack.c.bf16 %v1752_v5, %v1751_v4 }
 0x2ae   :  { %v3622_v55 = vadd.f32 %v1686_v52, %v1150_v7  ;;  %3257 = vmatmul.mubr.msk.f32.gmra.mrb[18].mxu1 %vm101_vm0, %v4521_v47  ;;  %v1753_v7 = vld [vmem:[#allocation2 + $0xe0] sm:$0xff] }
 0x2af   :  { %v4527_v56 = vadd.f32 %v3621_v51, %v4481_v8  ;;  %3562 = vmatpush3.bf16.msra.mxu1 %v3559_v40  ;;  %3275 = vmatprep.mubr.msk.f32.mxu1 %vm101_vm0, %v1713_v50  ;;  %v3587_v10 = vpack.c.bf16 %v1754_v9, %v1753_v7 }
 0x2b0   :  { %v4531_v57 = vadd.f32 %v3622_v55, %v4481_v8  ;;  %3564 = vmatprep.subr.bf16.mxu1 %v3563_v49  ;;  %v3603_v8 = vpack.c.bf16 %v1762_v22, %v1761_v21 }
 0x2b2   :  { %3276 = vmatmul.mubr.msk.f32.vlgmr.msra.gmra.mrb[12].mxu1 %vm101_vm0, %v4484_v13  ;;  %v3591_v13 = vpack.c.bf16 %v1756_v12, %v1755_v11 }
 0x2b3   :  { %3278 = vmatprep.mubr.msk.f32.mxu1 %vm101_vm0, %v4489_v19  ;;  %3566 = vmatpush3.bf16.msra.mxu1 %v3563_v49 }
 0x2b4   :  { %3568 = vmatprep.subr.bf16.mxu1 %v3567_v58 }
 0x2b6   :  { %3279 = vmatmul.mubr.msk.f32.gmra.mrb[14].mxu1 %vm101_vm0, %v4492_v25 }
 0x2b7   :  { %3281 = vmatprep.mubr.msk.f32.mxu1 %vm101_vm0, %v4499_v35  ;;  %3570 = vmatpush3.bf16.msra.mxu1 %v3567_v58 }
 0x2b8   :  { %3572 = vmatprep.subr.bf16.mxu1 %v3571_v61 }
 0x2ba   :  { %3282 = vmatmul.mubr.msk.f32.gmra.mrb[16].mxu1 %vm101_vm0, %v4502_v28 }
 0x2bb   :  { %3284 = vmatprep.mubr.msk.f32.mxu1 %vm101_vm0, %v4509_v38  ;;  %3574 = vmatpush3.bf16.msra.mxu1 %v3571_v61 }
 0x2bc   :  { %3576 = vmatprep.subr.bf16.mxu1 %v3575_v0 }
 0x2be   :  { %3285 = vmatmul.mubr.msk.f32.gmra.mrb[18].mxu1 %vm101_vm0, %v4512_v41 }
 0x2bf   :  { %3578 = vmatpush3.bf16.msra.mxu1 %v3575_v0  ;;  %3303 = vmatprep.mubr.msk.f32.mxu1 %vm101_vm0, %v4489_v19  ;;  %v3599_v19 = vpack.c.bf16 %v1760_v20, %v1759_v18 }
 0x2c0   :  { %3580 = vmatprep.subr.bf16.mxu1 %v3579_v3 }
 0x2c2   :  { %3304 = vmatmul.mubr.msk.f32.vlgmr.msra.gmra.mrb[12].mxu1 %vm101_vm0, %v4492_v25 }
 0x2c3   :  { %3306 = vmatprep.mubr.msk.f32.mxu1 %vm101_vm0, %v4499_v35  ;;  %3582 = vmatpush3.bf16.msra.mxu1 %v3579_v3 }
 0x2c4   :  { %3584 = vmatprep.subr.bf16.mxu1 %v3583_v6 }
 0x2c6   :  { %3307 = vmatmul.mubr.msk.f32.gmra.mrb[14].mxu1 %vm101_vm0, %v4502_v28 }
 0x2c7   :  { %3309 = vmatprep.mubr.msk.f32.mxu1 %vm101_vm0, %v4509_v38  ;;  %3586 = vmatpush3.bf16.msra.mxu1 %v3583_v6 }
 0x2c8   :  { %3588 = vmatprep.subr.bf16.mxu1 %v3587_v10 }
 0x2ca   :  { %3310 = vmatmul.mubr.msk.f32.gmra.mrb[16].mxu1 %vm101_vm0, %v4512_v41 }
 0x2cb   :  { %3312 = vmatprep.mubr.msk.f32.mxu1 %vm101_vm0, %v4521_v47  ;;  %3590 = vmatpush3.bf16.msra.mxu1 %v3587_v10 }
 0x2cc   :  { %3592 = vmatprep.subr.bf16.mxu1 %v3591_v13 }
 0x2ce   :  { %3313 = vmatmul.mubr.msk.f32.gmra.mrb[18].mxu1 %vm101_vm0, %v1722_v16 }
 0x2cf   :  { %3594 = vmatpush3.bf16.msra.mxu1 %v3591_v13  ;;  %3331 = vmatprep.mubr.msk.f32.mxu1 %vm101_vm0, %v4492_v25  ;;  %v3607_v25 = vpack.c.bf16 %v1764_v27, %v1763_v26 }
 0x2d0   :  { %3596 = vmatprep.subr.bf16.mxu1 %v3595_v17 }
 0x2d2   :  { %3332 = vmatmul.mubr.msk.f32.vlgmr.msra.gmra.mrb[12].mxu1 %vm101_vm0, %v4499_v35 }
 0x2d3   :  { %3334 = vmatprep.mubr.msk.f32.mxu1 %vm101_vm0, %v4502_v28  ;;  %3598 = vmatpush3.bf16.msra.mxu1 %v3595_v17 }
 0x2d4   :  { %3600 = vmatprep.subr.bf16.mxu1 %v3599_v19 }
 0x2d6   :  { %3335 = vmatmul.mubr.msk.f32.gmra.mrb[14].mxu1 %vm101_vm0, %v4509_v38 }
 0x2d7   :  { %3337 = vmatprep.mubr.msk.f32.mxu1 %vm101_vm0, %v4512_v41  ;;  %3602 = vmatpush3.bf16.msra.mxu1 %v3599_v19 }
 0x2d8   :  { %3604 = vmatprep.subr.bf16.mxu1 %v3603_v8 }
 0x2da   :  { %3338 = vmatmul.mubr.msk.f32.gmra.mrb[16].mxu1 %vm101_vm0, %v4521_v47 }
 0x2db   :  { %3340 = vmatprep.mubr.msk.f32.mxu1 %vm101_vm0, %v1722_v16  ;;  %3606 = vmatpush3.bf16.msra.mxu1 %v3603_v8 }
 0x2dc   :  { %3608 = vmatprep.subr.bf16.mxu1 %v3607_v25 }
 0x2de   :  { %3341 = vmatmul.mubr.msk.f32.gmra.mrb[18].mxu1 %vm101_vm0, %v4531_v57 }
 0x2df   :  { %3610 = vmatpush3.bf16.msra.mxu1 %v3607_v25  ;;  %3359 = vmatprep.mubr.msk.f32.mxu1 %vm101_vm0, %v4499_v35 }
 0x2e2   :  { %3360 = vmatmul.mubr.msk.f32.vlgmr.msra.gmra.mrb[12].mxu1 %vm101_vm0, %v4502_v28 }
 0x2e3   :  { %3362 = vmatprep.mubr.msk.f32.mxu1 %vm101_vm0, %v4509_v38 }
 0x2e6   :  { %3363 = vmatmul.mubr.msk.f32.gmra.mrb[14].mxu1 %vm101_vm0, %v4512_v41 }
 0x2e7   :  { %3365 = vmatprep.mubr.msk.f32.mxu1 %vm101_vm0, %v4521_v47 }
 0x2ea   :  { %3366 = vmatmul.mubr.msk.f32.gmra.mrb[16].mxu1 %vm101_vm0, %v1722_v16 }
 0x2eb   :  { %3368 = vmatprep.mubr.msk.f32.mxu1 %vm101_vm0, %v4531_v57 }
 0x2ee   :  { %3369 = vmatmul.mubr.msk.f32.gmra.mrb[18].mxu1 %vm101_vm0, %v4527_v56 }
 0x3b5   :  { %v3361_v31 = vpop.f32.mrb[12].mxu1 }
 0x3b6   :  { %v2358_v32 = vadd.f32 %v3361_v31, %v2560_v30  ;;  %v2304_v35 = vpop.f32.mrb[13].mxu1 }
 0x3b7   :  { %v2357_v23 = vadd.f32 %v2560_v30, %v2304_v35 }
 0x3b8   :  { %2366 = vst.msk [vmem:[%s4636_s7 + $0x8] sm:$0xff] %vm101_vm0, %v2358_v32 }
 0x3b9   :  { %2365 = vst.msk [vmem:[%s4636_s7] sm:$0xff] %vm101_vm0, %v2357_v23  ;;  %v3364_v24 = vpop.f32.mrb[14].mxu1 }
 0x3ba   :  { %v2360_v28 = vadd.f32 %v3364_v24, %v2560_v30  ;;  %v2314_v29 = vpop.f32.mrb[15].mxu1 }
 0x3bb   :  { %v2359_v33 = vadd.f32 %v2560_v30, %v2314_v29 }
 0x3bc   :  { %2368 = vst.msk [vmem:[%s4636_s7 + $0x18] sm:$0xff] %vm101_vm0, %v2360_v28 }
 0x3bd   :  { %2367 = vst.msk [vmem:[%s4636_s7 + $0x10] sm:$0xff] %vm101_vm0, %v2359_v33  ;;  %v3367_v34 = vpop.f32.mrb[16].mxu1 }
 0x3be   :  { %v2362_v36 = vadd.f32 %v3367_v34, %v2560_v30  ;;  %v2324_v37 = vpop.f32.mrb[17].mxu1 }
 0x3bf   :  { %v2361_v38 = vadd.f32 %v2560_v30, %v2324_v37 }
 0x3c0   :  { %2370 = vst.msk [vmem:[%s4636_s7 + $0x28] sm:$0xff] %vm101_vm0, %v2362_v36 }
 0x3c1   :  { %2369 = vst.msk [vmem:[%s4636_s7 + $0x20] sm:$0xff] %vm101_vm0, %v2361_v38  ;;  %v3370_v39 = vpop.f32.mrb[18].mxu1 }
 0x3c2   :  { %v2364_v40 = vadd.f32 %v3370_v39, %v2560_v30  ;;  %v2334_v41 = vpop.f32.mrb[19].mxu1 }
 0x3c3   :  { %v2363_v42 = vadd.f32 %v2560_v30, %v2334_v41 }
 0x3c4   :  { %2372 = vst.msk [vmem:[%s4636_s7 + $0x38] sm:$0xff] %vm101_vm0, %v2364_v40 }
 0x3c5   :  { %2371 = vst.msk [vmem:[%s4636_s7 + $0x30] sm:$0xff] %vm101_vm0, %v2363_v42 }
 0x3c6   :  { %2377 = vsyncpa [#allocation3], 1 }

</bundles_post_ra>
